<compile_context>
chip_gen: v7x
topology: tpu7x:2x2x1
jax: 0.10.0
libtpu: 0.0.40
codegen_flags: <defaults>
</compile_context>

<pallas_src>
import math
import functools

import jax
import jax.numpy as jnp
from jax.experimental import pallas as pl
from jax.experimental.pallas import tpu as pltpu


def mab_kernel(q_ref, k_ref, wq_ref, bq_ref, wk_ref, bk_ref, wv_ref, bv_ref,
               wo_ref, bo_ref, o_ref, *, Lq, Lk, dim_V, num_heads):
    """One grid step processes Bb batch elements, presented as row slabs."""
    rows_q = q_ref.shape[0]                 # Bb * Lq
    Bb = rows_q // Lq
    ds = dim_V // num_heads
    scale = 1.0 / math.sqrt(dim_V)

    # Linear projections as single wide matmuls (bf16 operands, f32 accumulation).
    q2 = q_ref[...]                         # bf16 (Bb*Lq, dim_Q)
    k2 = k_ref[...]                         # bf16 (Bb*Lk, dim_K)
    Qp = jnp.dot(q2, wq_ref[...], preferred_element_type=jnp.float32) + bq_ref[...]
    Kp = jnp.dot(k2, wk_ref[...], preferred_element_type=jnp.float32) + bk_ref[...]
    Vp = jnp.dot(k2, wv_ref[...], preferred_element_type=jnp.float32) + bv_ref[...]

    # 3-D views for batched attention.  These reshapes only split the leading row
    # dimension (last dim unchanged), so they are layout no-ops.
    Qs3 = (Qp * scale).reshape(Bb, Lq, dim_V)     # scale hoisted out of the head loop
    K3 = Kp.reshape(Bb, Lk, dim_V)
    V3 = Vp.reshape(Bb, Lk, dim_V)

    # Per-head attention (num_heads is small -> static unroll).  The residual
    # Q_ + A @ V_ is accumulated straight into the output block: no ctx list,
    # no lane-axis concatenate, bounded vreg live ranges.
    for h in range(num_heads):
        lo = h * ds
        Qh = Qs3[:, :, lo:lo + ds].astype(jnp.bfloat16)       # (Bb, Lq, ds)
        Kh = K3[:, :, lo:lo + ds].astype(jnp.bfloat16)        # (Bb, Lk, ds)
        Vh = V3[:, :, lo:lo + ds].astype(jnp.bfloat16)        # (Bb, Lk, ds)

        S = jnp.einsum("bqd,bkd->bqk", Qh, Kh,
                       preferred_element_type=jnp.float32)    # (Bb, Lq, Lk) f32
        # Numerically stable softmax along the last axis (torch.softmax(., 2)).
        S = S - jnp.max(S, axis=-1, keepdims=True)
        P = jnp.exp(S)
        inv = pl.reciprocal(jnp.sum(P, axis=-1, keepdims=True), approx=True)
        A = (P * inv).astype(jnp.bfloat16)
        ctx = jnp.einsum("bqk,bkd->bqd", A, Vh,
                         preferred_element_type=jnp.float32)  # (Bb, Lq, ds) f32

        o_ref[:, lo:lo + ds] = Qp[:, lo:lo + ds] + ctx.reshape(Bb * Lq, ds)

    # O = O + relu(fc_o(O)) as one wide matmul over all accumulated rows.
    O2 = o_ref[...]                                           # (Bb*Lq, dim_V) f32
    Oo = jnp.dot(O2.astype(jnp.bfloat16), wo_ref[...],
                 preferred_element_type=jnp.float32) + bo_ref[...]
    o_ref[...] = (O2 + jnp.maximum(Oo, 0.0)).astype(o_ref.dtype)


def mab_forward(Q, K, params, *, dim_V, num_heads, block_b=None):
    B, Lq, dim_Q = Q.shape
    Bk, Lk, dim_K = K.shape
    assert Bk == B
    wq, bq, wk, bk, wv, bv, wo, bo = params

    # Weights: transpose once to [in, out] and pre-cast to bf16 (native MXU path,
    # half the weight DMA bytes).  Biases stay f32 (added to f32 accumulators).
    wq_t = wq.T.astype(jnp.bfloat16)
    wk_t = wk.T.astype(jnp.bfloat16)
    wv_t = wv.T.astype(jnp.bfloat16)
    wo_t = wo.T.astype(jnp.bfloat16)
    bq32 = bq.astype(jnp.float32)
    bk32 = bk.astype(jnp.float32)
    bv32 = bv.astype(jnp.float32)
    bo32 = bo.astype(jnp.float32)

    # Activations in bf16: halves the input DMA bytes; matmuls accumulate in f32.
    Qb = Q.astype(jnp.bfloat16)
    Kb = K.astype(jnp.bfloat16)

    # ---- block sizing: biggest batch block that fits the per-generation VMEM ----
    try:
        vmem_cap = int(pltpu.get_tpu_info().vmem_capacity_bytes)
    except Exception:
        vmem_cap = 64 * 1024 * 1024          # conservative (v7x-sized) fallback
    vmem_limit = min(vmem_cap * 3 // 4, 100 * 1024 * 1024)
    block_budget = vmem_limit // 2           # headroom for compiler scratch

    if block_b is None:
        pad128 = lambda d: max(d, 128)       # lane padding of sub-128 minor dims
        # Rough per-batch-element VMEM bytes: double-buffered in/out blocks plus
        # in-kernel f32/bf16 intermediates (Qp/Kp/Vp, per-head S/P, fc_o temps).
        per_b = (2 * (Lq * pad128(dim_Q) + Lk * pad128(dim_K)) * 2   # bf16 inputs x2 bufs
                 + 2 * Lq * pad128(dim_V) * 4                        # f32 output x2 bufs
                 + (Lq + 2 * Lk) * pad128(dim_V) * 6                 # Qp/Kp/Vp (+bf16)
                 + 2 * Lq * pad128(Lk) * 4                           # S / P
                 + 2 * Lq * pad128(dim_V) * 4)                       # fc_o temporaries
        block_b = max(1, min(B, block_budget // max(per_b, 1)))

    if block_b < B:
        # Multi-step grid: keep every block's row dimension 8-aligned.
        block_b = min(B, ((block_b + 7) // 8) * 8)
    if block_b >= B:
        block_b = B                           # single full block, no padding
    Bb = block_b
    n_blocks = pl.cdiv(B, Bb)
    B_pad = n_blocks * Bb

    if B_pad != B:
        Qb = jnp.pad(Qb, ((0, B_pad - B), (0, 0), (0, 0)))
        Kb = jnp.pad(Kb, ((0, B_pad - B), (0, 0), (0, 0)))

    # Row-major 2-D slabs (batch*seq, features): free XLA reshapes, and the
    # kernel's remaining reshapes only split/merge the leading row dimension.
    Q2 = Qb.reshape(B_pad * Lq, dim_Q)
    K2 = Kb.reshape(B_pad * Lk, dim_K)

    kernel = functools.partial(mab_kernel, Lq=Lq, Lk=Lk, dim_V=dim_V,
                               num_heads=num_heads)

    def invariant(a):
        # Grid-invariant parameter: whole array every step, single buffer
        # (default double-buffering is pure VMEM waste for constant blocks).
        return pl.BlockSpec(a.shape, lambda i: (0,) * a.ndim,
                            pipeline_mode=pl.Buffered(1))

    out = pl.pallas_call(
        kernel,
        out_shape=jax.ShapeDtypeStruct((B_pad * Lq, dim_V), jnp.float32),
        grid_spec=pltpu.PrefetchScalarGridSpec(
            num_scalar_prefetch=0,
            grid=(n_blocks,),
            in_specs=[
                pl.BlockSpec((Bb * Lq, dim_Q), lambda i: (i, 0)),   # Q rows
                pl.BlockSpec((Bb * Lk, dim_K), lambda i: (i, 0)),   # K rows
                invariant(wq_t), invariant(bq32),
                invariant(wk_t), invariant(bk32),
                invariant(wv_t), invariant(bv32),
                invariant(wo_t), invariant(bo32),
            ],
            out_specs=pl.BlockSpec((Bb * Lq, dim_V), lambda i: (i, 0)),
        ),
        compiler_params=pltpu.CompilerParams(
            dimension_semantics=("parallel",),
            vmem_limit_bytes=int(vmem_limit)),
    )(Q2, K2, wq_t, bq32, wk_t, bk32, wv_t, bv32, wo_t, bo32)

    return out[:B * Lq].reshape(B, Lq, dim_V)


def mab_reference(Q, K, params, *, dim_V, num_heads):
    """Pure-JAX f32 reference mirroring the PyTorch forward (mask=None, ln=False)."""
    wq, bq, wk, bk, wv, bv, wo, bo = params
    Qp = Q @ wq.T + bq[0]
    Kp = K @ wk.T + bk[0]
    Vp = K @ wv.T + bv[0]
    ds = dim_V // num_heads

    def split_heads(X):  # torch.cat(X.split(ds, 2), 0)
        return jnp.concatenate(
            [X[:, :, h * ds:(h + 1) * ds] for h in range(num_heads)], axis=0)

    Q_, K_, V_ = split_heads(Qp), split_heads(Kp), split_heads(Vp)
    S = jnp.einsum("bqd,bkd->bqk", Q_, K_) / math.sqrt(dim_V)
    A = jax.nn.softmax(S, axis=2)
    O_ = Q_ + jnp.einsum("bqk,bkd->bqd", A, V_)
    B = Q.shape[0]
    O = jnp.concatenate([O_[h * B:(h + 1) * B] for h in range(num_heads)], axis=2)
    return O + jax.nn.relu(O @ wo.T + bo[0])


if __name__ == "__main__":
    # Small shapes consistent with the module; B=8 exercises the batched block path.
    B, Lq, Lk = 8, 8, 8
    dim_Q, dim_K, dim_V, num_heads = 32, 32, 32, 4

    key = jax.random.PRNGKey(0)
    keys = jax.random.split(key, 10)

    Q = jax.random.normal(keys[0], (B, Lq, dim_Q), dtype=jnp.float32)
    K = jax.random.normal(keys[1], (B, Lk, dim_K), dtype=jnp.float32)

    def linear_params(kw, kb, out_f, in_f):
        bound = 1.0 / math.sqrt(in_f)
        w = jax.random.uniform(kw, (out_f, in_f), jnp.float32, -bound, bound)
        b = jax.random.uniform(kb, (1, out_f), jnp.float32, -bound, bound)
        return w, b

    wq, bq = linear_params(keys[2], keys[3], dim_V, dim_Q)
    wk, bk = linear_params(keys[4], keys[5], dim_V, dim_K)
    wv, bv = linear_params(keys[6], keys[7], dim_V, dim_K)
    wo, bo = linear_params(keys[8], keys[9], dim_V, dim_V)
    params = (wq, bq, wk, bk, wv, bv, wo, bo)

    out = mab_forward(Q, K, params, dim_V=dim_V, num_heads=num_heads)
    out = jax.block_until_ready(out)

    ref = mab_reference(Q, K, params, dim_V=dim_V, num_heads=num_heads)
    assert out.shape == (B, Lq, dim_V)
    # Tolerance accounts for bf16 MXU operands (f32 accumulation) and the EUP
    # approximate reciprocal in the softmax denominator.
    assert jnp.allclose(out, ref, atol=3e-2, rtol=3e-2), "mismatch vs reference"

    print("KERNEL_OK")
</pallas_src>

<mosaic_0001>
module attributes {stable_mosaic.version = 11 : i64} {
  func.func @mab_kernel(%arg0: i32, %arg1: memref<64x32xbf16, #tpu.memory_space<vmem>>, %arg2: memref<64x32xbf16, #tpu.memory_space<vmem>>, %arg3: memref<32x32xbf16, #tpu.memory_space<vmem>>, %arg4: memref<1x32xf32, #tpu.memory_space<vmem>>, %arg5: memref<32x32xbf16, #tpu.memory_space<vmem>>, %arg6: memref<1x32xf32, #tpu.memory_space<vmem>>, %arg7: memref<32x32xbf16, #tpu.memory_space<vmem>>, %arg8: memref<1x32xf32, #tpu.memory_space<vmem>>, %arg9: memref<32x32xbf16, #tpu.memory_space<vmem>>, %arg10: memref<1x32xf32, #tpu.memory_space<vmem>>, %arg11: memref<64x32xf32, #tpu.memory_space<vmem>>) attributes {dimension_semantics = [#tpu.dimension_semantics<parallel>], iteration_bounds = array<i64: 1>, scalar_prefetch = 0 : i64, scratch_operands = 0 : i64, tpu.core_type = #tpu.core_type<tc>, window_params = [{transform_indices = @transform_0, window_bounds = array<i64: 64, 32>}, {transform_indices = @transform_1, window_bounds = array<i64: 64, 32>}, {pipeline_mode = #tpu.pipeline_mode<synchronous>, transform_indices = @transform_2, window_bounds = array<i64: 32, 32>}, {pipeline_mode = #tpu.pipeline_mode<synchronous>, transform_indices = @transform_3, window_bounds = array<i64: 1, 32>}, {pipeline_mode = #tpu.pipeline_mode<synchronous>, transform_indices = @transform_4, window_bounds = array<i64: 32, 32>}, {pipeline_mode = #tpu.pipeline_mode<synchronous>, transform_indices = @transform_5, window_bounds = array<i64: 1, 32>}, {pipeline_mode = #tpu.pipeline_mode<synchronous>, transform_indices = @transform_6, window_bounds = array<i64: 32, 32>}, {pipeline_mode = #tpu.pipeline_mode<synchronous>, transform_indices = @transform_7, window_bounds = array<i64: 1, 32>}, {pipeline_mode = #tpu.pipeline_mode<synchronous>, transform_indices = @transform_8, window_bounds = array<i64: 32, 32>}, {pipeline_mode = #tpu.pipeline_mode<synchronous>, transform_indices = @transform_9, window_bounds = array<i64: 1, 32>}, {transform_indices = @transform_10, window_bounds = array<i64: 64, 32>}]} {
    %c0 = arith.constant 0 : index
    %c0_0 = arith.constant 0 : index
    %0 = vector.load %arg1[%c0, %c0_0] : memref<64x32xbf16, #tpu.memory_space<vmem>>, vector<64x32xbf16>
    %c0_1 = arith.constant 0 : index
    %c0_2 = arith.constant 0 : index
    %1 = vector.load %arg2[%c0_1, %c0_2] : memref<64x32xbf16, #tpu.memory_space<vmem>>, vector<64x32xbf16>
    %c0_3 = arith.constant 0 : index
    %c0_4 = arith.constant 0 : index
    %2 = vector.load %arg3[%c0_3, %c0_4] : memref<32x32xbf16, #tpu.memory_space<vmem>>, vector<32x32xbf16>
    %cst = arith.constant dense<0.000000e+00> : vector<64x32xf32>
    %3 = tpu.matmul %0, %2, %cst {dimension_numbers = #tpu.dot_dimension_numbers<[1], [0], [0], [1], [0, 0, 1, 1], [], []>} : vector<64x32xbf16>, vector<32x32xbf16>, vector<64x32xf32> -> vector<64x32xf32>
    %c0_5 = arith.constant 0 : index
    %c0_6 = arith.constant 0 : index
    %4 = vector.load %arg4[%c0_5, %c0_6] : memref<1x32xf32, #tpu.memory_space<vmem>>, vector<1x32xf32>
    %5 = vector.broadcast %4 : vector<1x32xf32> to vector<64x32xf32>
    %6 = arith.addf %3, %5 : vector<64x32xf32>
    %c0_7 = arith.constant 0 : index
    %c0_8 = arith.constant 0 : index
    %7 = vector.load %arg5[%c0_7, %c0_8] : memref<32x32xbf16, #tpu.memory_space<vmem>>, vector<32x32xbf16>
    %cst_9 = arith.constant dense<0.000000e+00> : vector<64x32xf32>
    %8 = tpu.matmul %1, %7, %cst_9 {dimension_numbers = #tpu.dot_dimension_numbers<[1], [0], [0], [1], [0, 0, 1, 1], [], []>} : vector<64x32xbf16>, vector<32x32xbf16>, vector<64x32xf32> -> vector<64x32xf32>
    %c0_10 = arith.constant 0 : index
    %c0_11 = arith.constant 0 : index
    %9 = vector.load %arg6[%c0_10, %c0_11] : memref<1x32xf32, #tpu.memory_space<vmem>>, vector<1x32xf32>
    %10 = vector.broadcast %9 : vector<1x32xf32> to vector<64x32xf32>
    %11 = arith.addf %8, %10 : vector<64x32xf32>
    %c0_12 = arith.constant 0 : index
    %c0_13 = arith.constant 0 : index
    %12 = vector.load %arg7[%c0_12, %c0_13] : memref<32x32xbf16, #tpu.memory_space<vmem>>, vector<32x32xbf16>
    %cst_14 = arith.constant dense<0.000000e+00> : vector<64x32xf32>
    %13 = tpu.matmul %1, %12, %cst_14 {dimension_numbers = #tpu.dot_dimension_numbers<[1], [0], [0], [1], [0, 0, 1, 1], [], []>} : vector<64x32xbf16>, vector<32x32xbf16>, vector<64x32xf32> -> vector<64x32xf32>
    %c0_15 = arith.constant 0 : index
    %c0_16 = arith.constant 0 : index
    %14 = vector.load %arg8[%c0_15, %c0_16] : memref<1x32xf32, #tpu.memory_space<vmem>>, vector<1x32xf32>
    %15 = vector.broadcast %14 : vector<1x32xf32> to vector<64x32xf32>
    %16 = arith.addf %13, %15 : vector<64x32xf32>
    %cst_17 = arith.constant 0.176776692 : f32
    %17 = vector.broadcast %cst_17 : f32 to vector<64x32xf32>
    %18 = arith.mulf %6, %17 : vector<64x32xf32>
    %19 = vector.shape_cast %18 : vector<64x32xf32> to vector<8x8x32xf32>
    %20 = vector.shape_cast %11 : vector<64x32xf32> to vector<8x8x32xf32>
    %21 = vector.shape_cast %16 : vector<64x32xf32> to vector<8x8x32xf32>
    %22 = vector.extract_strided_slice %19 {offsets = [0, 0, 0], sizes = [8, 8, 8], strides = [1, 1, 1]} : vector<8x8x32xf32> to vector<8x8x8xf32>
    %23 = arith.truncf %22 : vector<8x8x8xf32> to vector<8x8x8xbf16>
    %24 = vector.extract_strided_slice %20 {offsets = [0, 0, 0], sizes = [8, 8, 8], strides = [1, 1, 1]} : vector<8x8x32xf32> to vector<8x8x8xf32>
    %25 = arith.truncf %24 : vector<8x8x8xf32> to vector<8x8x8xbf16>
    %26 = vector.extract_strided_slice %21 {offsets = [0, 0, 0], sizes = [8, 8, 8], strides = [1, 1, 1]} : vector<8x8x32xf32> to vector<8x8x8xf32>
    %27 = arith.truncf %26 : vector<8x8x8xf32> to vector<8x8x8xbf16>
    "tpu.trace_start"() <{level = 10 : i32, message = "bqd,bkd->bqk"}> : () -> ()
    %cst_18 = arith.constant dense<0.000000e+00> : vector<8x8x8xf32>
    %28 = tpu.matmul %23, %25, %cst_18 {dimension_numbers = #tpu.dot_dimension_numbers<[2], [2], [1], [1], [0, 0, 0, 1, 1, 1], [0], [0]>} : vector<8x8x8xbf16>, vector<8x8x8xbf16>, vector<8x8x8xf32> -> vector<8x8x8xf32>
    "tpu.trace_stop"() : () -> ()
    %cst_19 = arith.constant dense<0xFF800000> : vector<8x8xf32>
    %29 = vector.multi_reduction <maximumf>, %28, %cst_19 [2] : vector<8x8x8xf32> to vector<8x8xf32>
    %30 = vector.shape_cast %29 : vector<8x8xf32> to vector<8x8x1xf32>
    %31 = vector.broadcast %30 : vector<8x8x1xf32> to vector<8x8x8xf32>
    %32 = arith.subf %28, %31 : vector<8x8x8xf32>
    %33 = math.exp %32 : vector<8x8x8xf32>
    %cst_20 = arith.constant dense<0.000000e+00> : vector<8x8xf32>
    %34 = vector.multi_reduction <add>, %33, %cst_20 [2] : vector<8x8x8xf32> to vector<8x8xf32>
    %35 = vector.shape_cast %34 : vector<8x8xf32> to vector<8x8x1xf32>
    %36 = tpu.reciprocal %35 {approx = true} : vector<8x8x1xf32> -> vector<8x8x1xf32>
    %37 = vector.broadcast %36 : vector<8x8x1xf32> to vector<8x8x8xf32>
    %38 = arith.mulf %33, %37 : vector<8x8x8xf32>
    %39 = arith.truncf %38 : vector<8x8x8xf32> to vector<8x8x8xbf16>
    "tpu.trace_start"() <{level = 10 : i32, message = "bqk,bkd->bqd"}> : () -> ()
    %cst_21 = arith.constant dense<0.000000e+00> : vector<8x8x8xf32>
    %40 = tpu.matmul %39, %27, %cst_21 {dimension_numbers = #tpu.dot_dimension_numbers<[2], [1], [1], [2], [0, 0, 0, 1, 1, 2], [0], [0]>} : vector<8x8x8xbf16>, vector<8x8x8xbf16>, vector<8x8x8xf32> -> vector<8x8x8xf32>
    "tpu.trace_stop"() : () -> ()
    %41 = vector.extract_strided_slice %6 {offsets = [0, 0], sizes = [64, 8], strides = [1, 1]} : vector<64x32xf32> to vector<64x8xf32>
    %42 = vector.shape_cast %40 : vector<8x8x8xf32> to vector<64x8xf32>
    %43 = arith.addf %41, %42 : vector<64x8xf32>
    %c0_22 = arith.constant 0 : index
    %c0_23 = arith.constant 0 : index
    %44 = vector.load %arg11[%c0_22, %c0_23] : memref<64x32xf32, #tpu.memory_space<vmem>>, vector<64x8xf32>
    tpu.vector_store %arg11[%c0_22, %c0_23], %43 {strides = array<i32>} : memref<64x32xf32, #tpu.memory_space<vmem>>, vector<64x8xf32>,
    %45 = vector.extract_strided_slice %19 {offsets = [0, 0, 8], sizes = [8, 8, 8], strides = [1, 1, 1]} : vector<8x8x32xf32> to vector<8x8x8xf32>
    %46 = arith.truncf %45 : vector<8x8x8xf32> to vector<8x8x8xbf16>
    %47 = vector.extract_strided_slice %20 {offsets = [0, 0, 8], sizes = [8, 8, 8], strides = [1, 1, 1]} : vector<8x8x32xf32> to vector<8x8x8xf32>
    %48 = arith.truncf %47 : vector<8x8x8xf32> to vector<8x8x8xbf16>
    %49 = vector.extract_strided_slice %21 {offsets = [0, 0, 8], sizes = [8, 8, 8], strides = [1, 1, 1]} : vector<8x8x32xf32> to vector<8x8x8xf32>
    %50 = arith.truncf %49 : vector<8x8x8xf32> to vector<8x8x8xbf16>
    "tpu.trace_start"() <{level = 10 : i32, message = "bqd,bkd->bqk"}> : () -> ()
    %cst_24 = arith.constant dense<0.000000e+00> : vector<8x8x8xf32>
    %51 = tpu.matmul %46, %48, %cst_24 {dimension_numbers = #tpu.dot_dimension_numbers<[2], [2], [1], [1], [0, 0, 0, 1, 1, 1], [0], [0]>} : vector<8x8x8xbf16>, vector<8x8x8xbf16>, vector<8x8x8xf32> -> vector<8x8x8xf32>
    "tpu.trace_stop"() : () -> ()
    %cst_25 = arith.constant dense<0xFF800000> : vector<8x8xf32>
    %52 = vector.multi_reduction <maximumf>, %51, %cst_25 [2] : vector<8x8x8xf32> to vector<8x8xf32>
    %53 = vector.shape_cast %52 : vector<8x8xf32> to vector<8x8x1xf32>
    %54 = vector.broadcast %53 : vector<8x8x1xf32> to vector<8x8x8xf32>
    %55 = arith.subf %51, %54 : vector<8x8x8xf32>
    %56 = math.exp %55 : vector<8x8x8xf32>
    %cst_26 = arith.constant dense<0.000000e+00> : vector<8x8xf32>
    %57 = vector.multi_reduction <add>, %56, %cst_26 [2] : vector<8x8x8xf32> to vector<8x8xf32>
    %58 = vector.shape_cast %57 : vector<8x8xf32> to vector<8x8x1xf32>
    %59 = tpu.reciprocal %58 {approx = true} : vector<8x8x1xf32> -> vector<8x8x1xf32>
    %60 = vector.broadcast %59 : vector<8x8x1xf32> to vector<8x8x8xf32>
    %61 = arith.mulf %56, %60 : vector<8x8x8xf32>
    %62 = arith.truncf %61 : vector<8x8x8xf32> to vector<8x8x8xbf16>
    "tpu.trace_start"() <{level = 10 : i32, message = "bqk,bkd->bqd"}> : () -> ()
    %cst_27 = arith.constant dense<0.000000e+00> : vector<8x8x8xf32>
    %63 = tpu.matmul %62, %50, %cst_27 {dimension_numbers = #tpu.dot_dimension_numbers<[2], [1], [1], [2], [0, 0, 0, 1, 1, 2], [0], [0]>} : vector<8x8x8xbf16>, vector<8x8x8xbf16>, vector<8x8x8xf32> -> vector<8x8x8xf32>
    "tpu.trace_stop"() : () -> ()
    %64 = vector.extract_strided_slice %6 {offsets = [0, 8], sizes = [64, 8], strides = [1, 1]} : vector<64x32xf32> to vector<64x8xf32>
    %65 = vector.shape_cast %63 : vector<8x8x8xf32> to vector<64x8xf32>
    %66 = arith.addf %64, %65 : vector<64x8xf32>
    %c0_28 = arith.constant 0 : index
    %c8 = arith.constant 8 : index
    %67 = vector.load %arg11[%c0_28, %c8] : memref<64x32xf32, #tpu.memory_space<vmem>>, vector<64x8xf32>
    tpu.vector_store %arg11[%c0_28, %c8], %66 {strides = array<i32>} : memref<64x32xf32, #tpu.memory_space<vmem>>, vector<64x8xf32>,
    %68 = vector.extract_strided_slice %19 {offsets = [0, 0, 16], sizes = [8, 8, 8], strides = [1, 1, 1]} : vector<8x8x32xf32> to vector<8x8x8xf32>
    %69 = arith.truncf %68 : vector<8x8x8xf32> to vector<8x8x8xbf16>
    %70 = vector.extract_strided_slice %20 {offsets = [0, 0, 16], sizes = [8, 8, 8], strides = [1, 1, 1]} : vector<8x8x32xf32> to vector<8x8x8xf32>
    %71 = arith.truncf %70 : vector<8x8x8xf32> to vector<8x8x8xbf16>
    %72 = vector.extract_strided_slice %21 {offsets = [0, 0, 16], sizes = [8, 8, 8], strides = [1, 1, 1]} : vector<8x8x32xf32> to vector<8x8x8xf32>
    %73 = arith.truncf %72 : vector<8x8x8xf32> to vector<8x8x8xbf16>
    "tpu.trace_start"() <{level = 10 : i32, message = "bqd,bkd->bqk"}> : () -> ()
    %cst_29 = arith.constant dense<0.000000e+00> : vector<8x8x8xf32>
    %74 = tpu.matmul %69, %71, %cst_29 {dimension_numbers = #tpu.dot_dimension_numbers<[2], [2], [1], [1], [0, 0, 0, 1, 1, 1], [0], [0]>} : vector<8x8x8xbf16>, vector<8x8x8xbf16>, vector<8x8x8xf32> -> vector<8x8x8xf32>
    "tpu.trace_stop"() : () -> ()
    %cst_30 = arith.constant dense<0xFF800000> : vector<8x8xf32>
    %75 = vector.multi_reduction <maximumf>, %74, %cst_30 [2] : vector<8x8x8xf32> to vector<8x8xf32>
    %76 = vector.shape_cast %75 : vector<8x8xf32> to vector<8x8x1xf32>
    %77 = vector.broadcast %76 : vector<8x8x1xf32> to vector<8x8x8xf32>
    %78 = arith.subf %74, %77 : vector<8x8x8xf32>
    %79 = math.exp %78 : vector<8x8x8xf32>
    %cst_31 = arith.constant dense<0.000000e+00> : vector<8x8xf32>
    %80 = vector.multi_reduction <add>, %79, %cst_31 [2] : vector<8x8x8xf32> to vector<8x8xf32>
    %81 = vector.shape_cast %80 : vector<8x8xf32> to vector<8x8x1xf32>
    %82 = tpu.reciprocal %81 {approx = true} : vector<8x8x1xf32> -> vector<8x8x1xf32>
    %83 = vector.broadcast %82 : vector<8x8x1xf32> to vector<8x8x8xf32>
    %84 = arith.mulf %79, %83 : vector<8x8x8xf32>
    %85 = arith.truncf %84 : vector<8x8x8xf32> to vector<8x8x8xbf16>
    "tpu.trace_start"() <{level = 10 : i32, message = "bqk,bkd->bqd"}> : () -> ()
    %cst_32 = arith.constant dense<0.000000e+00> : vector<8x8x8xf32>
    %86 = tpu.matmul %85, %73, %cst_32 {dimension_numbers = #tpu.dot_dimension_numbers<[2], [1], [1], [2], [0, 0, 0, 1, 1, 2], [0], [0]>} : vector<8x8x8xbf16>, vector<8x8x8xbf16>, vector<8x8x8xf32> -> vector<8x8x8xf32>
    "tpu.trace_stop"() : () -> ()
    %87 = vector.extract_strided_slice %6 {offsets = [0, 16], sizes = [64, 8], strides = [1, 1]} : vector<64x32xf32> to vector<64x8xf32>
    %88 = vector.shape_cast %86 : vector<8x8x8xf32> to vector<64x8xf32>
    %89 = arith.addf %87, %88 : vector<64x8xf32>
    %c0_33 = arith.constant 0 : index
    %c16 = arith.constant 16 : index
    %90 = vector.load %arg11[%c0_33, %c16] : memref<64x32xf32, #tpu.memory_space<vmem>>, vector<64x8xf32>
    tpu.vector_store %arg11[%c0_33, %c16], %89 {strides = array<i32>} : memref<64x32xf32, #tpu.memory_space<vmem>>, vector<64x8xf32>,
    %91 = vector.extract_strided_slice %19 {offsets = [0, 0, 24], sizes = [8, 8, 8], strides = [1, 1, 1]} : vector<8x8x32xf32> to vector<8x8x8xf32>
    %92 = arith.truncf %91 : vector<8x8x8xf32> to vector<8x8x8xbf16>
    %93 = vector.extract_strided_slice %20 {offsets = [0, 0, 24], sizes = [8, 8, 8], strides = [1, 1, 1]} : vector<8x8x32xf32> to vector<8x8x8xf32>
    %94 = arith.truncf %93 : vector<8x8x8xf32> to vector<8x8x8xbf16>
    %95 = vector.extract_strided_slice %21 {offsets = [0, 0, 24], sizes = [8, 8, 8], strides = [1, 1, 1]} : vector<8x8x32xf32> to vector<8x8x8xf32>
    %96 = arith.truncf %95 : vector<8x8x8xf32> to vector<8x8x8xbf16>
    "tpu.trace_start"() <{level = 10 : i32, message = "bqd,bkd->bqk"}> : () -> ()
    %cst_34 = arith.constant dense<0.000000e+00> : vector<8x8x8xf32>
    %97 = tpu.matmul %92, %94, %cst_34 {dimension_numbers = #tpu.dot_dimension_numbers<[2], [2], [1], [1], [0, 0, 0, 1, 1, 1], [0], [0]>} : vector<8x8x8xbf16>, vector<8x8x8xbf16>, vector<8x8x8xf32> -> vector<8x8x8xf32>
    "tpu.trace_stop"() : () -> ()
    %cst_35 = arith.constant dense<0xFF800000> : vector<8x8xf32>
    %98 = vector.multi_reduction <maximumf>, %97, %cst_35 [2] : vector<8x8x8xf32> to vector<8x8xf32>
    %99 = vector.shape_cast %98 : vector<8x8xf32> to vector<8x8x1xf32>
    %100 = vector.broadcast %99 : vector<8x8x1xf32> to vector<8x8x8xf32>
    %101 = arith.subf %97, %100 : vector<8x8x8xf32>
    %102 = math.exp %101 : vector<8x8x8xf32>
    %cst_36 = arith.constant dense<0.000000e+00> : vector<8x8xf32>
    %103 = vector.multi_reduction <add>, %102, %cst_36 [2] : vector<8x8x8xf32> to vector<8x8xf32>
    %104 = vector.shape_cast %103 : vector<8x8xf32> to vector<8x8x1xf32>
    %105 = tpu.reciprocal %104 {approx = true} : vector<8x8x1xf32> -> vector<8x8x1xf32>
    %106 = vector.broadcast %105 : vector<8x8x1xf32> to vector<8x8x8xf32>
    %107 = arith.mulf %102, %106 : vector<8x8x8xf32>
    %108 = arith.truncf %107 : vector<8x8x8xf32> to vector<8x8x8xbf16>
    "tpu.trace_start"() <{level = 10 : i32, message = "bqk,bkd->bqd"}> : () -> ()
    %cst_37 = arith.constant dense<0.000000e+00> : vector<8x8x8xf32>
    %109 = tpu.matmul %108, %96, %cst_37 {dimension_numbers = #tpu.dot_dimension_numbers<[2], [1], [1], [2], [0, 0, 0, 1, 1, 2], [0], [0]>} : vector<8x8x8xbf16>, vector<8x8x8xbf16>, vector<8x8x8xf32> -> vector<8x8x8xf32>
    "tpu.trace_stop"() : () -> ()
    %110 = vector.extract_strided_slice %6 {offsets = [0, 24], sizes = [64, 8], strides = [1, 1]} : vector<64x32xf32> to vector<64x8xf32>
    %111 = vector.shape_cast %109 : vector<8x8x8xf32> to vector<64x8xf32>
    %112 = arith.addf %110, %111 : vector<64x8xf32>
    %c0_38 = arith.constant 0 : index
    %c24 = arith.constant 24 : index
    %113 = vector.load %arg11[%c0_38, %c24] : memref<64x32xf32, #tpu.memory_space<vmem>>, vector<64x8xf32>
    tpu.vector_store %arg11[%c0_38, %c24], %112 {strides = array<i32>} : memref<64x32xf32, #tpu.memory_space<vmem>>, vector<64x8xf32>,
    %c0_39 = arith.constant 0 : index
    %c0_40 = arith.constant 0 : index
    %114 = vector.load %arg11[%c0_39, %c0_40] : memref<64x32xf32, #tpu.memory_space<vmem>>, vector<64x32xf32>
    %115 = arith.truncf %114 : vector<64x32xf32> to vector<64x32xbf16>
    %c0_41 = arith.constant 0 : index
    %c0_42 = arith.constant 0 : index
    %116 = vector.load %arg9[%c0_41, %c0_42] : memref<32x32xbf16, #tpu.memory_space<vmem>>, vector<32x32xbf16>
    %cst_43 = arith.constant dense<0.000000e+00> : vector<64x32xf32>
    %117 = tpu.matmul %115, %116, %cst_43 {dimension_numbers = #tpu.dot_dimension_numbers<[1], [0], [0], [1], [0, 0, 1, 1], [], []>} : vector<64x32xbf16>, vector<32x32xbf16>, vector<64x32xf32> -> vector<64x32xf32>
    %c0_44 = arith.constant 0 : index
    %c0_45 = arith.constant 0 : index
    %118 = vector.load %arg10[%c0_44, %c0_45] : memref<1x32xf32, #tpu.memory_space<vmem>>, vector<1x32xf32>
    %119 = vector.broadcast %118 : vector<1x32xf32> to vector<64x32xf32>
    %120 = arith.addf %117, %119 : vector<64x32xf32>
    %cst_46 = arith.constant 0.000000e+00 : f32
    %121 = vector.broadcast %cst_46 : f32 to vector<64x32xf32>
    %122 = arith.maximumf %120, %121 : vector<64x32xf32>
    %123 = arith.addf %114, %122 : vector<64x32xf32>
    %c0_47 = arith.constant 0 : index
    %c0_48 = arith.constant 0 : index
    %124 = vector.load %arg11[%c0_47, %c0_48] : memref<64x32xf32, #tpu.memory_space<vmem>>, vector<64x32xf32>
    tpu.vector_store %arg11[%c0_47, %c0_48], %123 {strides = array<i32>} : memref<64x32xf32, #tpu.memory_space<vmem>>, vector<64x32xf32>,
    return
  }
  func.func @transform_0(%arg0: i32) -> (i32, i32) {
    %c0_i32 = arith.constant 0 : i32
    %c0_i32_0 = arith.constant 0 : i32
    return %arg0, %c0_i32 : i32, i32
  }
  func.func @transform_1(%arg0: i32) -> (i32, i32) {
    %c0_i32 = arith.constant 0 : i32
    %c0_i32_0 = arith.constant 0 : i32
    return %arg0, %c0_i32 : i32, i32
  }
  func.func @transform_2(%arg0: i32) -> (i32, i32) {
    %c0_i32 = arith.constant 0 : i32
    %c0_i32_0 = arith.constant 0 : i32
    %c0_i32_1 = arith.constant 0 : i32
    return %c0_i32, %c0_i32_0 : i32, i32
  }
  func.func @transform_3(%arg0: i32) -> (i32, i32) {
    %c0_i32 = arith.constant 0 : i32
    %c0_i32_0 = arith.constant 0 : i32
    %c0_i32_1 = arith.constant 0 : i32
    return %c0_i32, %c0_i32_0 : i32, i32
  }
  func.func @transform_4(%arg0: i32) -> (i32, i32) {
    %c0_i32 = arith.constant 0 : i32
    %c0_i32_0 = arith.constant 0 : i32
    %c0_i32_1 = arith.constant 0 : i32
    return %c0_i32, %c0_i32_0 : i32, i32
  }
  func.func @transform_5(%arg0: i32) -> (i32, i32) {
    %c0_i32 = arith.constant 0 : i32
    %c0_i32_0 = arith.constant 0 : i32
    %c0_i32_1 = arith.constant 0 : i32
    return %c0_i32, %c0_i32_0 : i32, i32
  }
  func.func @transform_6(%arg0: i32) -> (i32, i32) {
    %c0_i32 = arith.constant 0 : i32
    %c0_i32_0 = arith.constant 0 : i32
    %c0_i32_1 = arith.constant 0 : i32
    return %c0_i32, %c0_i32_0 : i32, i32
  }
  func.func @transform_7(%arg0: i32) -> (i32, i32) {
    %c0_i32 = arith.constant 0 : i32
    %c0_i32_0 = arith.constant 0 : i32
    %c0_i32_1 = arith.constant 0 : i32
    return %c0_i32, %c0_i32_0 : i32, i32
  }
  func.func @transform_8(%arg0: i32) -> (i32, i32) {
    %c0_i32 = arith.constant 0 : i32
    %c0_i32_0 = arith.constant 0 : i32
    %c0_i32_1 = arith.constant 0 : i32
    return %c0_i32, %c0_i32_0 : i32, i32
  }
  func.func @transform_9(%arg0: i32) -> (i32, i32) {
    %c0_i32 = arith.constant 0 : i32
    %c0_i32_0 = arith.constant 0 : i32
    %c0_i32_1 = arith.constant 0 : i32
    return %c0_i32, %c0_i32_0 : i32, i32
  }
  func.func @transform_10(%arg0: i32) -> (i32, i32) {
    %c0_i32 = arith.constant 0 : i32
    %c0_i32_0 = arith.constant 0 : i32
    return %arg0, %c0_i32 : i32, i32
  }
}

</mosaic_0001>

<bundles_post_ra>
// kernel: tpu_custom_call.1
= control target key start
LH: loop header
LB: loop body
LE: loop exit
PB: predicated region body
PF: predicated region fallthrough
CT: control target
= control target key end

     0   :  { %vm95_vm0 = vcmask 261120   ;;  %v5054_v14 = vmov 0.0   ;;  %vm5055_vm1 = vmmov 0   ;;  %vm413_vm2 = vcmask 64512   ;;  %s5057_s13 = smov 112   ;;  %s5058_s14 = smov 104   ;;  %s6333_s2 = inlined_call_operand.vmem [shape: bf16[32,32], index: 2, kind: input, shape index: {}]   ;;  %s6334_s0 = inlined_call_operand.vmem [shape: bf16[64,32], index: 0, kind: input, shape index: {}]   ;;  %s6335_s4 = inlined_call_operand.vmem [shape: bf16[32,32], index: 4, kind: input, shape index: {}]   ;;  %s6336_s1 = inlined_call_operand.vmem [shape: bf16[64,32], index: 1, kind: input, shape index: {}]   ;;  %s6337_s6 = inlined_call_operand.vmem [shape: bf16[32,32], index: 6, kind: input, shape index: {}]   ;;  %s6338_s5 = inlined_call_operand.vmem [shape: f32[1,32], index: 5, kind: input, shape index: {}]   ;;  %s6339_s3 = inlined_call_operand.vmem [shape: f32[1,32], index: 3, kind: input, shape index: {}]   ;;  %s6340_s7 = inlined_call_operand.vmem [shape: f32[1,32], index: 7, kind: input, shape index: {}]   ;;  %s6341_s10 = inlined_call_operand.vmem [shape: f32[64,32], index: 10, kind: output, shape index: {}]   ;;  %s6342_s8 = inlined_call_operand.vmem [shape: bf16[32,32], index: 8, kind: input, shape index: {}]   ;;  %s6343_s9 = inlined_call_operand.vmem [shape: f32[1,32], index: 9, kind: input, shape index: {}]  }
   0x1   :  { %v4910_v0 = vld [vmem:[%s6333_s2] sm:$0xff]   ;;  %v4911_v1 = vld [vmem:[%s6333_s2 + $0x8] sm:$0xff]   ;;  %v4912_v2 = vld [vmem:[%s6334_s0 + $0x10] sm:$0xff]   ;;  %vm881_vm3 = vcmask 1043456   ;;  %s5059_s15 = smov 8   ;;  %s5060_s16 = smov 16  }
   0x2   :  { %4898 = vmatprep.subr.bf16.mxu1 %v4910_v0  ;;  %4466 = vmatprep.subr.bf16.mxu0 %v4910_v0  ;;  %v4914_v3 = vld [vmem:[%s6335_s4] sm:$0xff]   ;;  %v4913_v4 = vld [vmem:[%s6334_s0 + $0x18] sm:$0xff]   ;;  %v4915_v5 = vld [vmem:[%s6335_s4 + $0x8] sm:$0xff]   ;;  %vm2207_vm4 = vcmask 130112   ;;  %vm3136_vm5 = vcmask 195712   ;;  %s5061_s19 = smov 24  }
   0x3   :  { %4900 = vmatpush3.bf16.msra.mxu1 %v4910_v0  ;;  %4467 = vmatpush3.bf16.msra.mxu0 %v4910_v0  ;;  %v4916_v6 = vld [vmem:[%s6336_s1] sm:$0xff]   ;;  %v4919_v8 = vld [vmem:[%s6334_s0 + $0x8] sm:$0xff]   ;;  %v4920_v11 = vld [vmem:[%s6336_s1 + $0x10] sm:$0xff]   ;;  %vm4065_vm6 = vcmask 261312  }
   0x4   :  { %4899 = vmatprep.subr.bf16.mxu1 %v4911_v1  ;;  %4474 = vmatprep.mubr.msk.bf16.mxu1 %vm95_vm0, %v4912_v2  ;;  %v4918_v7 = vld [vmem:[%s6334_s0] sm:$0xff]   ;;  %v4917_v10 = vld [vmem:[%s6336_s1 + $0x8] sm:$0xff]   ;;  %v4921_v12 = vld [vmem:[%s6336_s1 + $0x18] sm:$0xff]  }
   0x5   :  { %4468 = vmatprep.subr.bf16.mxu0 %v4911_v1  ;;  %4470 = vmatprep.mubr.msk.bf16.mxu0 %vm95_vm0, %v4918_v7  ;;  %v4922_v9 = vld [vmem:[%s6337_s6] sm:$0xff]   ;;  %v4923_v13 = vld [vmem:[%s6337_s6 + $0x8] sm:$0xff]  }
   0x6   :  { %v5184_v23 = vld [vmem:[%s6338_s5] ss:$0 sm:$0xff] }
   0x7   :  { %4901 = vmatpush3.bf16.msra.mxu1 %v4911_v1  ;;  %4469 = vmatpush3.bf16.msra.mxu0 %v4911_v1  ;;  %v5189_v24 = vld [vmem:[%s6339_s3] ss:$0 sm:$0xff] }
   0x8   :  { %4478 = vmatprep.subr.bf16.mxu1 %v4914_v3  ;;  %4490 = vmatprep.subr.bf16.mxu0 %v4922_v9 }
   0xa   :  { %4475 = vmatmul.mubr.msk.bf16.vlgmr.msra.gmra.mrb[0].mxu1 %vm95_vm0, %v4913_v4  ;;  %4471 = vmatmul.mubr.msk.bf16.vlgmr.msra.gmra.mrb[0].mxu0 %vm95_vm0, %v4919_v8 }
   0xb   :  { %4479 = vmatpush3.bf16.msra.mxu1 %v4914_v3  ;;  %4482 = vmatprep.mubr.msk.bf16.mxu1 %vm95_vm0, %v4916_v6 }
   0xc   :  { %4480 = vmatprep.subr.bf16.mxu1 %v4915_v5  ;;  %4494 = vmatprep.mubr.msk.bf16.mxu0 %vm95_vm0, %v4916_v6 }
   0xd   :  { %4491 = vmatpush3.bf16.msra.mxu0 %v4922_v9 }
   0xe   :  { %4492 = vmatprep.subr.bf16.mxu0 %v4923_v13 }
   0xf   :  { %4481 = vmatpush3.bf16.msra.mxu1 %v4915_v5 }
  0x10   :  { %4502 = vmatprep.subr.bf16.mxu1 %v5054_v14 }
  0x11   :  { %4493 = vmatpush3.bf16.msra.mxu0 %v4923_v13 }
  0x12   :  { %4483 = vmatmul.mubr.msk.bf16.vlgmr.msra.gmra.mrb[4].mxu1 %vm95_vm0, %v4917_v10  ;;  %4514 = vmatprep.subr.bf16.mxu0 %v5054_v14 }
  0x13   :  { %4486 = vmatprep.mubr.msk.bf16.mxu1 %vm95_vm0, %v4920_v11 }
  0x14   :  { %4495 = vmatmul.mubr.msk.bf16.vlgmr.msra.gmra.mrb[4].mxu0 %vm95_vm0, %v4917_v10 }
  0x15   :  { %4498 = vmatprep.mubr.msk.bf16.mxu0 %vm95_vm0, %v4920_v11 }
  0x1a   :  { %4487 = vmatmul.mubr.msk.bf16.gmra.mrb[8].mxu1 %vm95_vm0, %v4921_v12 }
  0x1b   :  { %4504 = vmatprep.mubr.msk.bf16.mxu1 %vm5055_vm1, %v5054_v14 }
  0x1c   :  { %4499 = vmatmul.mubr.msk.bf16.gmra.mrb[8].mxu0 %vm95_vm0, %v4921_v12 }
  0x1d   :  { %4516 = vmatprep.mubr.msk.bf16.mxu0 %vm5055_vm1, %v5054_v14 }
  0xdd   :  { %v4476_v15 = vpop.f32.mrb[0].mxu1  ;;  %v4472_v18 = vpop.f32.mrb[0].mxu0 }
  0xde   :  { %v158_v16 = vpop.f32.mrb[1].mxu1  ;;  %v142_v20 = vpop.f32.mrb[1].mxu0  ;;  %v5193_v28 = vadd.f32 %v4472_v18, %v5189_v24  ;;  %v5250_v59 = vadd.f32 %v4476_v15, %v5189_v24 }
  0xdf   :  { %v5177_v17 = vpop.f32.mrb[2].mxu1  ;;  %v4473_v21 = vpop.f32.mrb[2].mxu0  ;;  %v5197_v31 = vadd.f32 %v5189_v24, %v142_v20  ;;  %v5220_v48 = vadd.f32 %v5189_v24, %v158_v16 }
  0xe0   :  { %v5179_v19 = vpop.f32.mrb[3].mxu1  ;;  %v145_v22 = vpop.f32.mrb[3].mxu0  ;;  %v383_v35 = vmul.f32 0.17677669, %v5193_v28  ;;  %v5253_v60 = vadd.f32 %v4473_v21, %v5189_v24  ;;  %v387_v4 = vmul.f32 0.17677669, %v5250_v59  ;;  %v5303_v12 = vadd.f32 %v5177_v17, %v5189_v24 }
  0xe1   :  { %v381_v38 = vmul.f32 0.17677669, %v5197_v31  ;;  %v5226_v51 = vadd.f32 %v5189_v24, %v145_v22  ;;  %v385_v57 = vmul.f32 0.17677669, %v5220_v48  ;;  %v5280_v5 = vadd.f32 %v5189_v24, %v5179_v19  ;;  %v4236_v17 = vld [vmem:[%s6340_s7] ss:$0 sm:$0xff] }
  0xe2   :  { %v5212_v41 = vpack.c.bf16 %v383_v35, %v383_v35  ;;  %v384_v3 = vmul.f32 0.17677669, %v5253_v60  ;;  %v5285_v8 = vpack.c.bf16 %v387_v4, %v387_v4  ;;  %v388_v16 = vmul.f32 0.17677669, %v5303_v12  ;;  %s5056_s7 = smov 120  }
  0xe3   :  { %v5216_v44 = vpack.c.bf16 %v381_v38, %v381_v38  ;;  %v382_v56 = vmul.f32 0.17677669, %v5226_v51  ;;  %v5257_v62 = vpack.c.bf16 %v385_v57, %v385_v57  ;;  %v386_v11 = vmul.f32 0.17677669, %v5280_v5 }
  0xe4   :  { %v5283_v7 = vpack.c.bf16 %v384_v3, %v384_v3  ;;  %v5315_v18 = vpack.c.bf16 %v388_v16, %v388_v16 }
  0xe5   :  { %v4484_v25 = vpop.f32.mrb[4].mxu1  ;;  %v5255_v61 = vpack.c.bf16 %v382_v56, %v382_v56  ;;  %v5305_v13 = vpack.c.bf16 %v386_v11, %v386_v11 }
  0xe6   :  { %v271_v26 = vadd.f32 %v4484_v25, %v5184_v23  ;;  %v262_v27 = vpop.f32.mrb[5].mxu1 }
  0xe7   :  { %v263_v29 = vadd.f32 %v5184_v23, %v262_v27  ;;  %v4485_v30 = vpop.f32.mrb[6].mxu1  ;;  %v4496_v19 = vpop.f32.mrb[4].mxu0 }
  0xe8   :  { %v5199_v32 = vpack.c.bf16 %v271_v26, %v271_v26  ;;  %v265_v33 = vpop.f32.mrb[7].mxu1  ;;  %v274_v52 = vadd.f32 %v4485_v30, %v5184_v23  ;;  %v5324_v20 = vadd.f32 %v4496_v19, %v4236_v17  ;;  %v350_v21 = vpop.f32.mrb[5].mxu0 }
  0xe9   :  { %v5201_v34 = vpack.c.bf16 %v263_v29, %v263_v29  ;;  %v266_v37 = vadd.f32 %v5184_v23, %v265_v33  ;;  %v4497_v22 = vpop.f32.mrb[6].mxu0  ;;  %v351_v29 = vadd.f32 %v4236_v17, %v350_v21 }
  0xea   :  { %v510_v36 = vsel %vm413_vm2, %v5199_v32, 0  ;;  %v5247_v58 = vpack.c.bf16 %v274_v52, %v274_v52  ;;  %v353_v24 = vpop.f32.mrb[7].mxu0 }
  0xeb   :  { %4515 = vmatpush3.bf16.xpose.msra.mxu0 %v510_v36  ;;  %v418_v39 = vsel %vm413_vm2, %v5201_v34, 0  ;;  %v5214_v43 = vpack.c.bf16 %v266_v37, %v266_v37  ;;  %v354_v30 = vadd.f32 %v4236_v17, %v353_v24 }
  0xec   :  { %4503 = vmatpush3.bf16.xpose.msra.mxu1 %v418_v39  ;;  %4526 = vmatprep.subr.bf16.mxu0 %v5054_v14  ;;  %v556_v1 = vsel %vm413_vm2, %v5247_v58, 0  ;;  %v5336_v39 = vpack.c.bf16 %v351_v29, %v351_v29 }
  0xed   :  { %v4488_v40 = vpop.f32.mrb[8].mxu1  ;;  %4508 = vmatprep.subr.bf16.mxu1 %v5054_v14  ;;  %v464_v53 = vsel %vm413_vm2, %v5214_v43, 0 }
  0xee   :  { %v278_v42 = vpop.f32.mrb[9].mxu1  ;;  %v287_v49 = vadd.f32 %v4488_v40, %v5184_v23  ;;  %v5338_v40 = vpack.c.bf16 %v354_v30, %v354_v30 }
  0xef   :  { %v279_v45 = vadd.f32 %v5184_v23, %v278_v42  ;;  %v4489_v46 = vpop.f32.mrb[10].mxu1  ;;  %v4500_v25 = vpop.f32.mrb[8].mxu0  ;;  %v883_v42 = vsel %vm881_vm3, %v5336_v39, 0 }
  0xf0   :  { %v281_v47 = vpop.f32.mrb[11].mxu1  ;;  %v5239_v55 = vpack.c.bf16 %v287_v49, %v287_v49  ;;  %v290_v6 = vadd.f32 %v4489_v46, %v5184_v23  ;;  %v5328_v26 = vadd.f32 %v4500_v25, %v4236_v17  ;;  %v366_v27 = vpop.f32.mrb[9].mxu0 }
  0xf1   :  { %v5223_v50 = vpack.c.bf16 %v279_v45, %v279_v45  ;;  %v282_v0 = vadd.f32 %v5184_v23, %v281_v47  ;;  %v5326_v23 = vadd.f32 %v4497_v22, %v4236_v17  ;;  %v5330_v33 = vadd.f32 %v4236_v17, %v366_v27  ;;  %v4501_v35 = vpop.f32.mrb[10].mxu0 }
  0xf2   :  { %4517 = vmatmul.mubr.msk.bf16.vlgmr.msra.gmra.mrb[12].mxu0 %vm413_vm2, %v5212_v41  ;;  %v694_v63 = vsel %vm413_vm2, %v5239_v55, 0  ;;  %v5295_v10 = vpack.c.bf16 %v290_v6, %v290_v6  ;;  %v5332_v36 = vadd.f32 %v4501_v35, %v4236_v17  ;;  %v369_v37 = vpop.f32.mrb[11].mxu0  ;;  %v929_v45 = vsel %vm881_vm3, %v5338_v40, 0 }
  0xf3   :  { %4505 = vmatmul.mubr.msk.bf16.vlgmr.msra.gmra.mrb[12].mxu1 %vm413_vm2, %v5216_v44  ;;  %v602_v54 = vsel %vm413_vm2, %v5223_v50, 0  ;;  %4528 = vmatprep.mubr.msk.bf16.mxu0 %vm5055_vm1, %v5054_v14  ;;  %v5268_v2 = vpack.c.bf16 %v282_v0, %v282_v0  ;;  %v5334_v38 = vadd.f32 %v4236_v17, %v369_v37 }
  0xf4   :  { %4509 = vmatpush3.bf16.xpose.msra.mxu1 %v464_v53  ;;  %4527 = vmatpush3.bf16.xpose.msra.mxu0 %v602_v54  ;;  %v740_v15 = vsel %vm413_vm2, %v5295_v10, 0 }
  0xf5   :  { %4510 = vmatprep.mubr.msk.bf16.mxu1 %vm5055_vm1, %v5054_v14  ;;  %4520 = vmatprep.subr.bf16.mxu1 %v5054_v14  ;;  %v648_v9 = vsel %vm413_vm2, %v5268_v2, 0 }
  0xf6   :  { %4538 = vmatprep.subr.bf16.mxu0 %v5054_v14 }
  0xfb   :  { %4511 = vmatmul.mubr.msk.bf16.vlgmr.msra.gmra.mrb[16].mxu1 %vm413_vm2, %v5255_v61  ;;  %4529 = vmatmul.mubr.msk.bf16.vlgmr.msra.gmra.mrb[16].mxu0 %vm413_vm2, %v5257_v62 }
  0xfc   :  { %4521 = vmatpush3.bf16.xpose.msra.mxu1 %v556_v1  ;;  %4539 = vmatpush3.bf16.xpose.msra.mxu0 %v694_v63 }
  0xfd   :  { %4522 = vmatprep.mubr.msk.bf16.mxu1 %vm5055_vm1, %v5054_v14  ;;  %4540 = vmatprep.mubr.msk.bf16.mxu0 %vm5055_vm1, %v5054_v14 }
  0xfe   :  { %4532 = vmatprep.subr.bf16.mxu1 %v5054_v14  ;;  %4550 = vmatprep.subr.bf16.mxu0 %v5054_v14 }
 0x103   :  { %4523 = vmatmul.mubr.msk.bf16.vlgmr.msra.gmra.mrb[20].mxu1 %vm413_vm2, %v5283_v7  ;;  %4541 = vmatmul.mubr.msk.bf16.vlgmr.msra.gmra.mrb[20].mxu0 %vm413_vm2, %v5285_v8 }
 0x104   :  { %4533 = vmatpush3.bf16.xpose.msra.mxu1 %v648_v9  ;;  %4534 = vmatprep.mubr.msk.bf16.mxu1 %vm5055_vm1, %v5054_v14 }
 0x105   :  { %4544 = vmatprep.subr.bf16.mxu1 %v5054_v14  ;;  %4552 = vmatprep.mubr.msk.bf16.mxu0 %vm5055_vm1, %v5054_v14 }
 0x106   :  { %4551 = vmatpush3.bf16.msra.mxu0 %v883_v42 }
 0x107   :  { %4562 = vmatprep.subr.bf16.mxu0 %v5054_v14 }
 0x10b   :  { %4535 = vmatmul.mubr.msk.bf16.vlgmr.msra.gmra.mrb[24].mxu1 %vm413_vm2, %v5305_v13 }
 0x10c   :  { %4545 = vmatpush3.bf16.xpose.msra.mxu1 %v740_v15  ;;  %4546 = vmatprep.mubr.msk.bf16.mxu1 %vm5055_vm1, %v5054_v14 }
 0x10d   :  { %4556 = vmatprep.subr.bf16.mxu1 %v5054_v14 }
 0x113   :  { %4547 = vmatmul.mubr.msk.bf16.vlgmr.msra.gmra.mrb[28].mxu1 %vm413_vm2, %v5315_v18 }
 0x114   :  { %4558 = vmatprep.mubr.msk.bf16.mxu1 %vm5055_vm1, %v5054_v14  ;;  %4557 = vmatpush3.bf16.msra.mxu1 %v929_v45 }
 0x115   :  { %4568 = vmatprep.subr.bf16.mxu1 %v5054_v14 }
 0x1c5   :  { %v546_v46 = vpop.f32.mrb[12].mxu0 }
 0x1c6   :  { %v454_v47 = vpop.f32.mrb[12].mxu1  ;;  %v788_v49 = vsel %vm413_vm2, %v546_v46, -inf  ;;  %v4518_v52 = vpop.f32.mrb[13].mxu0 }
 0x1c7   :  { %789 = vmax.xlane.f32.xlu1 %v788_v49  ;;  %v782_v53 = vsel %vm413_vm2, %v454_v47, -inf  ;;  %v4506_v54 = vpop.f32.mrb[13].mxu1  ;;  %v549_v56 = vpop.f32.mrb[14].mxu0 }
 0x1c8   :  { %783 = vmax.xlane.f32.xlu0 %v782_v53  ;;  %v457_v57 = vpop.f32.mrb[14].mxu1  ;;  %v4519_v63 = vpop.f32.mrb[15].mxu0 }
 0x1c9   :  { %v4507_v0 = vpop.f32.mrb[15].mxu1 }
 0x1ce   :  { %v500_v1 = vpop.f32.mrb[16].mxu1  ;;  %v638_v3 = vpop.f32.mrb[16].mxu0 }
 0x1cf   :  { %v4512_v4 = vpop.f32.mrb[17].mxu1  ;;  %v4530_v6 = vpop.f32.mrb[17].mxu0  ;;  %v785_v9 = vsel %vm413_vm2, %v500_v1, -inf  ;;  %v794_v19 = vsel %vm413_vm2, %v638_v3, -inf }
 0x1d0   :  { %v641_v11 = vpop.f32.mrb[18].mxu0  ;;  %786 = vmax.xlane.f32.xlu0 %v785_v9  ;;  %v503_v15 = vpop.f32.mrb[18].mxu1 }
 0x1d1   :  { %v4513_v16 = vpop.f32.mrb[19].mxu1  ;;  %v4531_v17 = vpop.f32.mrb[19].mxu0 }
 0x1d4   :  { %795 = vmax.xlane.f32.xlu0 %v794_v19 }
 0x1d6   :  { %v592_v21 = vpop.f32.mrb[20].mxu1  ;;  %v730_v22 = vpop.f32.mrb[20].mxu0 }
 0x1d7   :  { %v4524_v24 = vpop.f32.mrb[21].mxu1  ;;  %v4542_v25 = vpop.f32.mrb[21].mxu0  ;;  %v800_v27 = vsel %vm413_vm2, %v730_v22, -inf  ;;  %v791_v29 = vsel %vm413_vm2, %v592_v21, -inf }
 0x1d8   :  { %v733_v30 = vpop.f32.mrb[22].mxu0  ;;  %801 = vmax.xlane.f32.xlu0 %v800_v27  ;;  %792 = vmax.xlane.f32.xlu1 %v791_v29  ;;  %v595_v35 = vpop.f32.mrb[22].mxu1 }
 0x1d9   :  { %v4525_v37 = vpop.f32.mrb[23].mxu1  ;;  %v4543_v42 = vpop.f32.mrb[23].mxu0 }
 0x1de   :  { %v684_v45 = vpop.f32.mrb[24].mxu1 }
 0x1df   :  { %v4536_v49 = vpop.f32.mrb[25].mxu1  ;;  %v797_v52 = vsel %vm413_vm2, %v684_v45, -inf }
 0x1e0   :  { %798 = vmax.xlane.f32.xlu1 %v797_v52  ;;  %v687_v53 = vpop.f32.mrb[26].mxu1 }
 0x1e1   :  { %v4537_v54 = vpop.f32.mrb[27].mxu1 }
 0x1e6   :  { %v5353_v56 = vpop.f32.mrb[28].mxu1 }
 0x1e7   :  { %v4548_v57 = vpop.f32.mrb[29].mxu1  ;;  %v803_v63 = vsel %vm413_vm2, %v5353_v56, -inf }
 0x1e8   :  { %804 = vmax.xlane.f32.xlu1 %v803_v63  ;;  %v779_v0 = vpop.f32.mrb[30].mxu1 }
 0x1e9   :  { %v4549_v4 = vpop.f32.mrb[31].mxu1 }
 0x254   :  { %v790_v6 = vpop.xlane.xlu1 %789 }
 0x255   :  { %v808_v9 = vsub.f32 %v546_v46, %v790_v6  ;;  %v784_v11 = vpop.xlane.xlu0 %783 }
 0x256   :  { %v806_v15 = vsub.f32 %v454_v47, %v784_v11 }
 0x257   :  { %v818_v16 = vmul.f32 1.442695, %v808_v9 }
 0x258   :  { %v814_v17 = vmul.f32 1.442695, %v806_v15 }
 0x25a   :  { %4926 = vpow2.f32 %v814_v17 }
 0x25b   :  { %4928 = vpow2.f32 %v818_v16 }
 0x25d   :  { %v787_v19 = vpop.xlane.xlu0 %786 }
 0x25e   :  { %v807_v24 = vsub.f32 %v500_v1, %v787_v19 }
 0x260   :  { %v816_v25 = vmul.f32 1.442695, %v807_v24 }
 0x261   :  { %v796_v27 = vpop.xlane.xlu0 %795 }
 0x262   :  { %4930 = vpow2.f32 %v816_v25  ;;  %v810_v29 = vsub.f32 %v638_v3, %v796_v27 }
 0x264   :  { %v5357_v30 = vpop.eup %4926  ;;  %v822_v35 = vmul.f32 1.442695, %v810_v29 }
 0x265   :  { %v802_v37 = vpop.xlane.xlu0 %801  ;;  %v793_v42 = vpop.xlane.xlu1 %792  ;;  %v830_v46 = vsel %vm413_vm2, %v5357_v30, 0.0 }
 0x266   :  { %v5361_v49 = vpop.eup %4928  ;;  %4932 = vpow2.f32 %v822_v35  ;;  %v812_v47 = vsub.f32 %v730_v22, %v802_v37  ;;  %v809_v52 = vsub.f32 %v592_v21, %v793_v42  ;;  %831 = vadd.xlane.f32.xlu0 %v830_v46  ;;  %v5420_v42 = vpack.c.bf16 %v5324_v20, %v5324_v20 }
 0x267   :  { %v836_v54 = vsel %vm413_vm2, %v5361_v49, 0.0 }
 0x268   :  { %v826_v53 = vmul.f32 1.442695, %v812_v47  ;;  %v820_v1 = vmul.f32 1.442695, %v809_v52 }
 0x26a   :  { %4934 = vpow2.f32 %v826_v53  ;;  %837 = vadd.xlane.f32.xlu0 %v836_v54 }
 0x26b   :  { %4936 = vpow2.f32 %v820_v1  ;;  %v975_v1 = vsel %vm881_vm3, %v5420_v42, 0 }
 0x26c   :  { %v5365_v3 = vpop.eup %4930 }
 0x26d   :  { %v833_v57 = vsel %vm413_vm2, %v5365_v3, 0.0  ;;  %v799_v9 = vpop.xlane.xlu1 %798 }
 0x26e   :  { %834 = vadd.xlane.f32.xlu1 %v833_v57  ;;  %v811_v11 = vsub.f32 %v684_v45, %v799_v9 }
 0x270   :  { %v5369_v63 = vpop.eup %4932  ;;  %v824_v15 = vmul.f32 1.442695, %v811_v11 }
 0x271   :  { %v842_v21 = vsel %vm413_vm2, %v5369_v63, 0.0 }
 0x272   :  { %843 = vadd.xlane.f32.xlu0 %v842_v21  ;;  %4938 = vpow2.f32 %v824_v15  ;;  %v5436_v21 = vpack.c.bf16 %v5326_v23, %v5326_v23 }
 0x274   :  { %v5373_v22 = vpop.eup %4934  ;;  %v1021_v23 = vsel %vm881_vm3, %v5436_v21, 0 }
 0x275   :  { %v5375_v0 = vpop.eup %4936  ;;  %v848_v4 = vsel %vm413_vm2, %v5373_v22, 0.0  ;;  %v805_v17 = vpop.xlane.xlu1 %804 }
 0x276   :  { %849 = vadd.xlane.f32.xlu0 %v848_v4  ;;  %v839_v6 = vsel %vm413_vm2, %v5375_v0, 0.0  ;;  %v813_v19 = vsub.f32 %v5353_v56, %v805_v17  ;;  %v5440_v4 = vpack.c.bf16 %v5330_v33, %v5330_v33  ;;  %v5466_v17 = vpack.c.bf16 %v5334_v38, %v5334_v38 }
 0x277   :  { %840 = vadd.xlane.f32.xlu1 %v839_v6 }
 0x278   :  { %v828_v24 = vmul.f32 1.442695, %v813_v19  ;;  %v1113_v38 = vsel %vm881_vm3, %v5466_v17, 0 }
 0x27a   :  { %4940 = vpow2.f32 %v828_v24 }
 0x27c   :  { %v5397_v16 = vpop.eup %4938 }
 0x27d   :  { %v845_v45 = vsel %vm413_vm2, %v5397_v16, 0.0 }
 0x284   :  { %v5406_v25 = vpop.eup %4940 }
 0x285   :  { %v851_v27 = vsel %vm413_vm2, %v5406_v25, 0.0 }
 0x288   :  { %1319 = vrot.lane.b32.xlu1 %v5214_v43, %s5056_s7 }
 0x28c   :  { %1267 = vrot.lane.b32.xlu0 %v5201_v34, %s5056_s7 }
 0x290   :  { %1371 = vrot.lane.b32.xlu0 %v5199_v32, %s5056_s7 }
 0x294   :  { %1368 = vrot.lane.b32.xlu0 %v5212_v41, %s5056_s7 }
 0x298   :  { %1475 = vrot.lane.b32.xlu0 %v5223_v50, %s5056_s7 }
 0x29c   :  { %1472 = vrot.lane.b32.xlu0 %v5257_v62, %s5056_s7 }
 0x2a0   :  { %1579 = vrot.lane.b32.xlu0 %v5239_v55, %s5056_s7 }
 0x2a4   :  { %1576 = vrot.lane.b32.xlu0 %v5285_v8, %s5056_s7 }
 0x2a8   :  { %1776 = vrot.lane.b32.xlu0 %v5336_v39, %s5056_s7 }
 0x2ac   :  { %846 = vadd.xlane.f32.xlu1 %v845_v45  ;;  %v5461_v45 = vpack.c.bf16 %v5328_v26, %v5328_v26 }
 0x2ae   :  { %v1159_v26 = vsel %vm881_vm3, %v5461_v45, 0 }
 0x2bd   :  { %1264 = vrot.lane.b32.xlu1 %v5216_v44, %s5056_s7 }
 0x2e1   :  { %852 = vadd.xlane.f32.xlu1 %v851_v27 }
 0x2f2   :  { %1316 = vrot.lane.b32.xlu1 %v5255_v61, %s5056_s7 }
 0x2f3   :  { %v832_v29 = vpop.xlane.xlu0 %831 }
 0x2f4   :  { %4942 = vrcp.f32 %v832_v29 }
 0x2f6   :  { %1423 = vrot.lane.b32.xlu1 %v5247_v58, %s5056_s7 }
 0x2f7   :  { %v838_v35 = vpop.xlane.xlu0 %837 }
 0x2f8   :  { %4944 = vrcp.f32 %v838_v35 }
 0x2fa   :  { %1420 = vrot.lane.b32.xlu1 %v5283_v7, %s5056_s7 }
 0x2fb   :  { %v835_v56 = vpop.xlane.xlu1 %834 }
 0x2fc   :  { %4946 = vrcp.f32 %v835_v56 }
 0x2fe   :  { %v4943_v37 = vpop.eup %4942  ;;  %1527 = vrot.lane.b32.xlu1 %v5268_v2, %s5056_s7 }
 0x2ff   :  { %v844_v46 = vpop.xlane.xlu0 %843  ;;  %v862_v47 = vmul.f32 %v4943_v37, %v5357_v30 }
 0x300   :  { %4948 = vrcp.f32 %v844_v46 }
 0x301   :  { %v870_v52 = vpack.c.bf16 %v862_v47, %v862_v47 }
 0x302   :  { %v4945_v53 = vpop.eup %4944  ;;  %1524 = vrot.lane.b32.xlu1 %v5305_v13, %s5056_s7 }
 0x303   :  { %4553 = vmatmul.mubr.msk.bf16.vlgmr.msra.gmra.mrb[24].mxu0 %vm413_vm2, %v870_v52  ;;  %v850_v20 = vpop.xlane.xlu0 %849  ;;  %v864_v30 = vmul.f32 %v4945_v53, %v5361_v49  ;;  %v1067_v49 = vsel %vm881_vm3, %v5440_v4, 0 }
 0x304   :  { %4563 = vmatpush3.bf16.msra.mxu0 %v975_v1  ;;  %v841_v54 = vpop.xlane.xlu1 %840  ;;  %4564 = vmatprep.mubr.msk.bf16.mxu0 %vm5055_vm1, %v5054_v14 }
 0x305   :  { %4950 = vrcp.f32 %v841_v54  ;;  %4574 = vmatprep.subr.bf16.mxu0 %v5054_v14  ;;  %v872_v9 = vpack.c.bf16 %v864_v30, %v864_v30  ;;  %v5498_v30 = vpack.c.bf16 %v5332_v36, %v5332_v36 }
 0x306   :  { %v4947_v57 = vpop.eup %4946  ;;  %1631 = vrot.lane.b32.xlu1 %v5295_v10, %s5056_s7  ;;  %4952 = vrcp.f32 %v850_v20 }
 0x307   :  { %v863_v6 = vmul.f32 %v4947_v57, %v5365_v3  ;;  %v1268_v29 = vpop.permute.xlu0 %1267  ;;  %v1205_v36 = vsel %vm881_vm3, %v5498_v30, 0 }
 0x308   :  { %v1273_v56 = vsel %vm413_vm2, %v1268_v29, 0  ;;  %v1320_v37 = vpop.permute.xlu1 %1319 }
 0x309   :  { %v871_v11 = vpack.c.bf16 %v863_v6, %v863_v6 }
 0x30a   :  { %v4949_v15 = vpop.eup %4948  ;;  %1628 = vrot.lane.b32.xlu1 %v5315_v18, %s5056_s7 }
 0x30b   :  { %4565 = vmatmul.mubr.msk.bf16.vlgmr.msra.gmra.mrb[28].mxu0 %vm413_vm2, %v872_v9  ;;  %4559 = vmatmul.mubr.msk.bf16.vlgmr.msra.gmra.mrb[32].mxu1 %vm413_vm2, %v871_v11  ;;  %v866_v33 = vmul.f32 %v4949_v15, %v5369_v63 }
 0x30c   :  { %4575 = vmatpush3.bf16.msra.mxu0 %v1067_v49  ;;  %4569 = vmatpush3.bf16.msra.mxu1 %v1021_v23 }
 0x30d   :  { %4570 = vmatprep.mubr.msk.bf16.mxu1 %vm5055_vm1, %v5054_v14  ;;  %4576 = vmatprep.mubr.msk.bf16.mxu0 %vm5055_vm1, %v5054_v14  ;;  %v874_v24 = vpack.c.bf16 %v866_v33, %v866_v33 }
 0x30e   :  { %1825 = vrot.lane.b32.xlu1 %v5338_v40, %s5056_s7  ;;  %4580 = vmatprep.subr.bf16.mxu1 %v5054_v14 }
 0x30f   :  { %v4951_v3 = vpop.eup %4950  ;;  %4586 = vmatprep.subr.bf16.mxu0 %v5054_v14 }
 0x310   :  { %v865_v19 = vmul.f32 %v4951_v3, %v5375_v0  ;;  %v4953_v63 = vpop.eup %4952 }
 0x311   :  { %v868_v0 = vmul.f32 %v4953_v63, %v5373_v22  ;;  %v1372_v22 = vpop.permute.xlu0 %1371 }
 0x312   :  { %1874 = vrot.lane.b32.xlu1 %v5420_v42, %s5056_s7  ;;  %v873_v27 = vpack.c.bf16 %v865_v19, %v865_v19  ;;  %v1377_v1 = vsel %vm413_vm2, %v1372_v22, 0 }
 0x313   :  { %4577 = vmatmul.mubr.msk.bf16.vlgmr.msra.gmra.mrb[32].mxu0 %vm413_vm2, %v874_v24  ;;  %v876_v35 = vpack.c.bf16 %v868_v0, %v868_v0 }
 0x314   :  { %4587 = vmatpush3.bf16.msra.mxu0 %v1159_v26  ;;  %4571 = vmatmul.mubr.msk.bf16.vlgmr.msra.gmra.mrb[36].mxu1 %vm413_vm2, %v873_v27 }
 0x315   :  { %4581 = vmatpush3.bf16.msra.mxu1 %v1113_v38  ;;  %4588 = vmatprep.mubr.msk.bf16.mxu0 %vm5055_vm1, %v5054_v14  ;;  %v1369_v46 = vpop.permute.xlu0 %1368  ;;  %v1325_v38 = vsel %vm413_vm2, %v1320_v37, 0 }
 0x316   :  { %1923 = vrot.lane.b32.xlu1 %v5436_v21, %s5056_s7  ;;  %4598 = vmatprep.subr.bf16.mxu0 %v5054_v14 }
 0x317   :  { %4582 = vmatprep.mubr.msk.bf16.mxu1 %vm5055_vm1, %v5054_v14  ;;  %4592 = vmatprep.subr.bf16.mxu1 %v5054_v14 }
 0x319   :  { %v1476_v52 = vpop.permute.xlu0 %1475 }
 0x31a   :  { %v1481_v6 = vsel %vm413_vm2, %v1476_v52, 0 }
 0x31b   :  { %4589 = vmatmul.mubr.msk.bf16.vlgmr.msra.gmra.mrb[36].mxu0 %vm413_vm2, %v876_v35 }
 0x31c   :  { %4600 = vmatprep.mubr.msk.bf16.mxu0 %vm5055_vm1, %v5054_v14 }
 0x31d   :  { %4599 = vmatpush3.bf16.xpose.msra.mxu0 %v1273_v56  ;;  %v1473_v54 = vpop.permute.xlu0 %1472 }
 0x31e   :  { %4610 = vmatprep.subr.bf16.mxu0 %v5054_v14 }
 0x321   :  { %v1580_v9 = vpop.permute.xlu0 %1579 }
 0x322   :  { %v1585_v15 = vsel %vm413_vm2, %v1580_v9, 0 }
 0x339   :  { %v847_v47 = vpop.xlane.xlu1 %846 }
 0x33a   :  { %4954 = vrcp.f32 %v847_v47 }
 0x33d   :  { %v1265_v53 = vpop.permute.xlu1 %1264 }
 0x33e   :  { %4601 = vmatmul.mubr.msk.bf16.vlgmr.msra.gmra.mrb[40].mxu0 %vm413_vm2, %v1265_v53 }
 0x33f   :  { %4611 = vmatpush3.bf16.xpose.msra.mxu0 %v1377_v1  ;;  %4612 = vmatprep.mubr.msk.bf16.mxu0 %vm5055_vm1, %v5054_v14 }
 0x340   :  { %4622 = vmatprep.subr.bf16.mxu0 %v5054_v14 }
 0x344   :  { %v4955_v20 = vpop.eup %4954 }
 0x345   :  { %v867_v57 = vmul.f32 %v4955_v20, %v5397_v16  ;;  %v1577_v16 = vpop.permute.xlu0 %1576 }
 0x346   :  { %4613 = vmatmul.mubr.msk.bf16.vlgmr.msra.gmra.mrb[44].mxu0 %vm413_vm2, %v1369_v46 }
 0x347   :  { %4623 = vmatpush3.bf16.xpose.msra.mxu0 %v1481_v6  ;;  %v875_v11 = vpack.c.bf16 %v867_v57, %v867_v57  ;;  %4624 = vmatprep.mubr.msk.bf16.mxu0 %vm5055_vm1, %v5054_v14 }
 0x348   :  { %4634 = vmatprep.subr.bf16.mxu0 %v5054_v14 }
 0x349   :  { %4583 = vmatmul.mubr.msk.bf16.vlgmr.msra.gmra.mrb[40].mxu1 %vm413_vm2, %v875_v11  ;;  %v1777_v49 = vpop.permute.xlu0 %1776 }
 0x34a   :  { %4593 = vmatpush3.bf16.msra.mxu1 %v1205_v36  ;;  %4594 = vmatprep.mubr.msk.bf16.mxu1 %vm5055_vm1, %v5054_v14  ;;  %v1782_v23 = vsel %vm881_vm3, %v1777_v49, 0 }
 0x34b   :  { %4604 = vmatprep.subr.bf16.mxu1 %v5054_v14 }
 0x34e   :  { %4625 = vmatmul.mubr.msk.bf16.vlgmr.msra.gmra.mrb[48].mxu0 %vm413_vm2, %v1473_v54 }
 0x34f   :  { %4635 = vmatpush3.bf16.xpose.msra.mxu0 %v1585_v15  ;;  %4636 = vmatprep.mubr.msk.bf16.mxu0 %vm5055_vm1, %v5054_v14 }
 0x350   :  { %4646 = vmatprep.subr.bf16.mxu0 %v5054_v14 }
 0x356   :  { %4637 = vmatmul.mubr.msk.bf16.vlgmr.msra.gmra.mrb[52].mxu0 %vm413_vm2, %v1577_v16 }
 0x357   :  { %4647 = vmatpush3.bf16.msra.mxu0 %v1782_v23  ;;  %4648 = vmatprep.mubr.msk.bf16.mxu0 %vm5055_vm1, %v5054_v14 }
 0x358   :  { %4658 = vmatprep.subr.bf16.mxu0 %v5054_v14 }
 0x36e   :  { %v853_v33 = vpop.xlane.xlu1 %852 }
 0x36f   :  { %4956 = vrcp.f32 %v853_v33 }
 0x372   :  { %v1317_v3 = vpop.permute.xlu1 %1316 }
 0x376   :  { %v1424_v19 = vpop.permute.xlu1 %1423 }
 0x377   :  { %v1429_v29 = vsel %vm413_vm2, %v1424_v19, 0 }
 0x379   :  { %v4957_v24 = vpop.eup %4956 }
 0x37a   :  { %v869_v63 = vmul.f32 %v4957_v24, %v5406_v25  ;;  %v1421_v26 = vpop.permute.xlu1 %1420 }
 0x37c   :  { %v877_v27 = vpack.c.bf16 %v869_v63, %v869_v63 }
 0x37e   :  { %4595 = vmatmul.mubr.msk.bf16.vlgmr.msra.gmra.mrb[44].mxu1 %vm413_vm2, %v877_v27  ;;  %v1528_v0 = vpop.permute.xlu1 %1527 }
 0x37f   :  { %4605 = vmatpush3.bf16.xpose.msra.mxu1 %v1325_v38  ;;  %4606 = vmatprep.mubr.msk.bf16.mxu1 %vm5055_vm1, %v5054_v14  ;;  %v1533_v35 = vsel %vm413_vm2, %v1528_v0, 0 }
 0x380   :  { %4616 = vmatprep.subr.bf16.mxu1 %v5054_v14 }
 0x382   :  { %v1525_v25 = vpop.permute.xlu1 %1524 }
 0x386   :  { %4607 = vmatmul.mubr.msk.bf16.vlgmr.msra.gmra.mrb[48].mxu1 %vm413_vm2, %v1317_v3  ;;  %v1632_v56 = vpop.permute.xlu1 %1631 }
 0x387   :  { %4617 = vmatpush3.bf16.xpose.msra.mxu1 %v1429_v29  ;;  %4618 = vmatprep.mubr.msk.bf16.mxu1 %vm5055_vm1, %v5054_v14  ;;  %v1637_v37 = vsel %vm413_vm2, %v1632_v56, 0 }
 0x388   :  { %4628 = vmatprep.subr.bf16.mxu1 %v5054_v14 }
 0x38a   :  { %v1629_v22 = vpop.permute.xlu1 %1628 }
 0x38e   :  { %4619 = vmatmul.mubr.msk.bf16.vlgmr.msra.gmra.mrb[52].mxu1 %vm413_vm2, %v1421_v26  ;;  %v1826_v46 = vpop.permute.xlu1 %1825 }
 0x38f   :  { %4629 = vmatpush3.bf16.xpose.msra.mxu1 %v1533_v35  ;;  %4630 = vmatprep.mubr.msk.bf16.mxu1 %vm5055_vm1, %v5054_v14  ;;  %v1831_v47 = vsel %vm881_vm3, %v1826_v46, 0 }
 0x390   :  { %4640 = vmatprep.subr.bf16.mxu1 %v5054_v14 }
 0x396   :  { %4631 = vmatmul.mubr.msk.bf16.vlgmr.msra.gmra.mrb[56].mxu1 %vm413_vm2, %v1525_v25 }
 0x397   :  { %4641 = vmatpush3.bf16.xpose.msra.mxu1 %v1637_v37  ;;  %4642 = vmatprep.mubr.msk.bf16.mxu1 %vm5055_vm1, %v5054_v14 }
 0x398   :  { %4652 = vmatprep.subr.bf16.mxu1 %v5054_v14 }
 0x39e   :  { %4643 = vmatmul.mubr.msk.bf16.vlgmr.msra.gmra.mrb[60].mxu1 %vm413_vm2, %v1629_v22 }
 0x39f   :  { %4653 = vmatpush3.bf16.msra.mxu1 %v1831_v47  ;;  %4654 = vmatprep.mubr.msk.bf16.mxu1 %vm5055_vm1, %v5054_v14 }
 0x3a0   :  { %4664 = vmatprep.subr.bf16.mxu1 %v5054_v14 }
 0x3d6   :  { %v919_v52 = vpop.f32.mrb[24].mxu0 }
 0x3d7   :  { %v1247_v53 = vadd.f32 %v919_v52, %v5197_v31  ;;  %v4554_v1 = vpop.f32.mrb[25].mxu0 }
 0x3d8   :  { %v922_v54 = vpop.f32.mrb[26].mxu0 }
 0x3d9   :  { %1255 = vst.msk [vmem:[%s6341_s10] sm:$0xff] %vm413_vm2, %v1247_v53  ;;  %v4555_v20 = vpop.f32.mrb[27].mxu0 }
 0x3de   :  { %v965_v57 = vpop.f32.mrb[32].mxu1  ;;  %v1011_v6 = vpop.f32.mrb[28].mxu0 }
 0x3df   :  { %v1248_v9 = vadd.f32 %v965_v57, %v5226_v51  ;;  %v1249_v11 = vadd.f32 %v1011_v6, %v5193_v28  ;;  %v4560_v36 = vpop.f32.mrb[33].mxu1  ;;  %v4566_v16 = vpop.f32.mrb[29].mxu0 }
 0x3e0   :  { %v968_v15 = vpop.f32.mrb[34].mxu1  ;;  %v1014_v49 = vpop.f32.mrb[30].mxu0 }
 0x3e1   :  { %1256 = vst.msk [vmem:[%s6341_s10 + $0x8] sm:$0xff] %vm413_vm2, %v1248_v9  ;;  %1257 = vst.msk [vmem:[%s6341_s10 + $0x10] sm:$0xff] %vm413_vm2, %v1249_v11  ;;  %v4561_v23 = vpop.f32.mrb[35].mxu1  ;;  %v4567_v33 = vpop.f32.mrb[31].mxu0 }
 0x3e6   :  { %v1103_v3 = vpop.f32.mrb[32].mxu0 }
 0x3e7   :  { %v1057_v19 = vpop.f32.mrb[36].mxu1  ;;  %v1251_v24 = vadd.f32 %v1103_v3, %v5220_v48  ;;  %v4578_v63 = vpop.f32.mrb[33].mxu0 }
 0x3e8   :  { %v1250_v27 = vadd.f32 %v1057_v19, %v5253_v60  ;;  %v4572_v26 = vpop.f32.mrb[37].mxu1  ;;  %v1106_v38 = vpop.f32.mrb[34].mxu0 }
 0x3e9   :  { %1259 = vst.msk [vmem:[%s6341_s10 + $0x20] sm:$0xff] %vm413_vm2, %v1251_v24  ;;  %v1060_v0 = vpop.f32.mrb[38].mxu1  ;;  %v4579_v29 = vpop.f32.mrb[35].mxu0 }
 0x3ea   :  { %1258 = vst.msk [vmem:[%s6341_s10 + $0x18] sm:$0xff] %vm413_vm2, %v1250_v27  ;;  %v4573_v25 = vpop.f32.mrb[39].mxu1 }
 0x3ee   :  { %v1195_v35 = vpop.f32.mrb[36].mxu0 }
 0x3ef   :  { %v1253_v56 = vadd.f32 %v1195_v35, %v5250_v59  ;;  %v4590_v22 = vpop.f32.mrb[37].mxu0 }
 0x3f0   :  { %v1198_v37 = vpop.f32.mrb[38].mxu0 }
 0x3f1   :  { %1261 = vst.msk [vmem:[%s6341_s10 + $0x30] sm:$0xff] %vm413_vm2, %v1253_v56  ;;  %v4591_v46 = vpop.f32.mrb[39].mxu0 }
 0x411   :  { %v5578_v47 = vpop.f32.mrb[40].mxu0 }
 0x412   :  { %v4602_v52 = vpop.f32.mrb[41].mxu0  ;;  %v1679_v53 = vsel %vm413_vm2, %v5578_v47, -inf }
 0x413   :  { %1680 = vmax.xlane.f32.xlu0 %v1679_v53  ;;  %v1312_v1 = vpop.f32.mrb[42].mxu0 }
 0x414   :  { %v4603_v54 = vpop.f32.mrb[43].mxu0 }
 0x419   :  { %v1413_v20 = vpop.f32.mrb[44].mxu0 }
 0x41a   :  { %v4614_v57 = vpop.f32.mrb[45].mxu0  ;;  %v1685_v6 = vsel %vm413_vm2, %v1413_v20, -inf }
 0x41b   :  { %1686 = vmax.xlane.f32.xlu0 %v1685_v6  ;;  %v1416_v9 = vpop.f32.mrb[46].mxu0 }
 0x41c   :  { %v1149_v11 = vpop.f32.mrb[40].mxu1  ;;  %v4615_v36 = vpop.f32.mrb[47].mxu0 }
 0x41d   :  { %v1252_v16 = vadd.f32 %v1149_v11, %v5280_v5  ;;  %v4584_v15 = vpop.f32.mrb[41].mxu1 }
 0x41e   :  { %v1152_v49 = vpop.f32.mrb[42].mxu1 }
 0x41f   :  { %1260 = vst.msk [vmem:[%s6341_s10 + $0x28] sm:$0xff] %vm413_vm2, %v1252_v16  ;;  %v4585_v23 = vpop.f32.mrb[43].mxu1 }
 0x421   :  { %v5588_v33 = vpop.f32.mrb[48].mxu0 }
 0x422   :  { %v4626_v3 = vpop.f32.mrb[49].mxu0  ;;  %v1691_v11 = vsel %vm413_vm2, %v5588_v33, -inf }
 0x423   :  { %v1520_v19 = vpop.f32.mrb[50].mxu0 }
 0x424   :  { %v4627_v24 = vpop.f32.mrb[51].mxu0 }
 0x429   :  { %v5590_v63 = vpop.f32.mrb[52].mxu0 }
 0x42a   :  { %v4638_v27 = vpop.f32.mrb[53].mxu0  ;;  %v1697_v15 = vsel %vm413_vm2, %v5590_v63, -inf }
 0x42b   :  { %v1624_v26 = vpop.f32.mrb[54].mxu0 }
 0x42c   :  { %v4639_v38 = vpop.f32.mrb[55].mxu0 }
 0x451   :  { %v1241_v0 = vpop.f32.mrb[44].mxu1 }
 0x452   :  { %v1254_v29 = vadd.f32 %v1241_v0, %v5303_v12  ;;  %v4596_v25 = vpop.f32.mrb[45].mxu1 }
 0x453   :  { %v1244_v35 = vpop.f32.mrb[46].mxu1 }
 0x454   :  { %1262 = vst.msk [vmem:[%s6341_s10 + $0x38] sm:$0xff] %vm413_vm2, %v1254_v29  ;;  %v4597_v56 = vpop.f32.mrb[47].mxu1 }
 0x459   :  { %v1361_v22 = vpop.f32.mrb[48].mxu1 }
 0x45a   :  { %v4608_v37 = vpop.f32.mrb[49].mxu1  ;;  %v1682_v46 = vsel %vm413_vm2, %v1361_v22, -inf }
 0x45b   :  { %1683 = vmax.xlane.f32.xlu1 %v1682_v46  ;;  %v1364_v52 = vpop.f32.mrb[50].mxu1 }
 0x45c   :  { %v4609_v53 = vpop.f32.mrb[51].mxu1 }
 0x461   :  { %v1465_v1 = vpop.f32.mrb[52].mxu1 }
 0x462   :  { %v4620_v54 = vpop.f32.mrb[53].mxu1  ;;  %v1688_v57 = vsel %vm413_vm2, %v1465_v1, -inf }
 0x463   :  { %1689 = vmax.xlane.f32.xlu0 %v1688_v57  ;;  %v1468_v6 = vpop.f32.mrb[54].mxu1  ;;  %v1875_v57 = vpop.permute.xlu1 %1874 }
 0x464   :  { %v4621_v9 = vpop.f32.mrb[55].mxu1 }
 0x467   :  { %1692 = vmax.xlane.f32.xlu0 %v1691_v11  ;;  %v5615_v6 = vpop.permute.xlu1 %1923 }
 0x469   :  { %v1569_v36 = vpop.f32.mrb[56].mxu1 }
 0x46a   :  { %v4632_v16 = vpop.f32.mrb[57].mxu1  ;;  %v1694_v49 = vsel %vm413_vm2, %v1569_v36, -inf }
 0x46b   :  { %1698 = vmax.xlane.f32.xlu0 %v1697_v15  ;;  %1695 = vmax.xlane.f32.xlu1 %v1694_v49  ;;  %v1572_v23 = vpop.f32.mrb[58].mxu1 }
 0x46c   :  { %v4633_v3 = vpop.f32.mrb[59].mxu1 }
 0x471   :  { %v5604_v19 = vpop.f32.mrb[60].mxu1 }
 0x472   :  { %v4644_v24 = vpop.f32.mrb[61].mxu1  ;;  %v1700_v38 = vsel %vm413_vm2, %v5604_v19, -inf }
 0x473   :  { %v1676_v27 = vpop.f32.mrb[62].mxu1 }
 0x474   :  { %v4645_v26 = vpop.f32.mrb[63].mxu1 }
 0x47c   :  { %2021 = vrot.lane.b32.xlu1 %v5466_v17, %s5056_s7 }
 0x481   :  { %1972 = vrot.lane.b32.xlu0 %v5440_v4, %s5056_s7 }
 0x4a0   :  { %v1681_v0 = vpop.xlane.xlu0 %1680  ;;  %1701 = vmax.xlane.f32.xlu1 %v1700_v38 }
 0x4a1   :  { %v1703_v29 = vsub.f32 %v5578_v47, %v1681_v0 }
 0x4a3   :  { %v1711_v25 = vmul.f32 1.442695, %v1703_v29 }
 0x4a5   :  { %4958 = vpow2.f32 %v1711_v25 }
 0x4a8   :  { %v1687_v35 = vpop.xlane.xlu0 %1686 }
 0x4a9   :  { %v1705_v56 = vsub.f32 %v1413_v20, %v1687_v35 }
 0x4ab   :  { %v1715_v37 = vmul.f32 1.442695, %v1705_v56 }
 0x4ad   :  { %4960 = vpow2.f32 %v1715_v37 }
 0x4af   :  { %v4959_v46 = vpop.eup %4958 }
 0x4b0   :  { %v1727_v52 = vsel %vm413_vm2, %v4959_v46, 0.0 }
 0x4b1   :  { %1728 = vadd.xlane.f32.xlu0 %v1727_v52 }
 0x4b7   :  { %v4961_v53 = vpop.eup %4960 }
 0x4b8   :  { %v1733_v54 = vsel %vm413_vm2, %v4961_v53, 0.0 }
 0x4b9   :  { %1734 = vadd.xlane.f32.xlu0 %v1733_v54 }
 0x4e8   :  { %v1684_v9 = vpop.xlane.xlu1 %1683 }
 0x4e9   :  { %v1704_v11 = vsub.f32 %v1361_v22, %v1684_v9 }
 0x4eb   :  { %v1713_v47 = vmul.f32 1.442695, %v1704_v11 }
 0x4ed   :  { %4962 = vpow2.f32 %v1713_v47 }
 0x4f0   :  { %v1690_v16 = vpop.xlane.xlu0 %1689 }
 0x4f1   :  { %v1706_v15 = vsub.f32 %v1465_v1, %v1690_v16 }
 0x4f3   :  { %v1717_v20 = vmul.f32 1.442695, %v1706_v15 }
 0x4f4   :  { %v1693_v49 = vpop.xlane.xlu0 %1692 }
 0x4f5   :  { %4964 = vpow2.f32 %v1717_v20  ;;  %v1707_v23 = vsub.f32 %v5588_v33, %v1693_v49  ;;  %v1880_v20 = vsel %vm881_vm3, %v1875_v57, 0 }
 0x4f7   :  { %v5618_v3 = vpop.eup %4962  ;;  %v1719_v24 = vmul.f32 1.442695, %v1707_v23 }
 0x4f8   :  { %v1730_v27 = vsel %vm413_vm2, %v5618_v3, 0.0  ;;  %v1696_v33 = vpop.xlane.xlu1 %1695  ;;  %v1699_v29 = vpop.xlane.xlu0 %1698 }
 0x4f9   :  { %4966 = vpow2.f32 %v1719_v24  ;;  %1731 = vadd.xlane.f32.xlu1 %v1730_v27  ;;  %v1708_v0 = vsub.f32 %v1569_v36, %v1696_v33  ;;  %v1709_v25 = vsub.f32 %v5590_v63, %v1699_v29 }
 0x4fb   :  { %v1721_v35 = vmul.f32 1.442695, %v1708_v0  ;;  %v1723_v56 = vmul.f32 1.442695, %v1709_v25 }
 0x4fc   :  { %v1973_v11 = vpop.permute.xlu0 %1972  ;;  %v2022_v49 = vpop.permute.xlu1 %2021 }
 0x4fd   :  { %4968 = vpow2.f32 %v1721_v35 }
 0x4fe   :  { %4970 = vpow2.f32 %v1723_v56 }
 0x4ff   :  { %v5622_v26 = vpop.eup %4964 }
 0x500   :  { %v1736_v22 = vsel %vm413_vm2, %v5622_v26, 0.0 }
 0x501   :  { %1737 = vadd.xlane.f32.xlu1 %v1736_v22  ;;  %v1978_v22 = vsel %vm881_vm3, %v1973_v11, 0 }
 0x503   :  { %v5626_v1 = vpop.eup %4966 }
 0x504   :  { %v1739_v38 = vsel %vm413_vm2, %v5626_v1, 0.0 }
 0x505   :  { %1740 = vadd.xlane.f32.xlu0 %v1739_v38 }
 0x507   :  { %v5635_v37 = vpop.eup %4968 }
 0x508   :  { %v1742_v52 = vsel %vm413_vm2, %v5635_v37, 0.0  ;;  %v5639_v54 = vpop.eup %4970 }
 0x509   :  { %v1745_v9 = vsel %vm413_vm2, %v5639_v54, 0.0 }
 0x512   :  { %2119 = vrot.lane.b32.xlu1 %v5498_v30, %s5056_s7 }
 0x51b   :  { %2070 = vrot.lane.b32.xlu0 %v5461_v45, %s5056_s7 }
 0x52d   :  { %v1702_v24 = vpop.xlane.xlu1 %1701 }
 0x52e   :  { %v1710_v57 = vsub.f32 %v5604_v19, %v1702_v24 }
 0x536   :  { %1743 = vadd.xlane.f32.xlu1 %v1742_v52  ;;  %v1929_v52 = vsel %vm881_vm3, %v5615_v6, 0  ;;  %v2027_v6 = vsel %vm881_vm3, %v2022_v49, 0 }
 0x53a   :  { %1746 = vadd.xlane.f32.xlu0 %v1745_v9 }
 0x53e   :  { %v1729_v36 = vpop.xlane.xlu0 %1728 }
 0x53f   :  { %4972 = vrcp.f32 %v1729_v36 }
 0x546   :  { %v1735_v63 = vpop.xlane.xlu0 %1734 }
 0x547   :  { %4974 = vrcp.f32 %v1735_v63  ;;  %2268 = vrot.lane.b32.xlu1 %v5214_v43, %s5057_s13 }
 0x549   :  { %v4973_v47 = vpop.eup %4972 }
 0x54a   :  { %v1759_v16 = vmul.f32 %v4973_v47, %v4959_v46 }
 0x54c   :  { %v1767_v15 = vpack.c.bf16 %v1759_v16, %v1759_v16 }
 0x54e   :  { %4649 = vmatmul.mubr.msk.bf16.vlgmr.msra.gmra.mrb[56].mxu0 %vm413_vm2, %v1767_v15 }
 0x54f   :  { %4659 = vmatpush3.bf16.msra.mxu0 %v1880_v20  ;;  %4660 = vmatprep.mubr.msk.bf16.mxu0 %vm5055_vm1, %v5054_v14 }
 0x550   :  { %2218 = vrot.lane.b32.xlu0 %v5201_v34, %s5057_s13  ;;  %4670 = vmatprep.subr.bf16.mxu0 %v5054_v14 }
 0x551   :  { %v4975_v23 = vpop.eup %4974 }
 0x552   :  { %v1761_v27 = vmul.f32 %v4975_v23, %v4961_v53  ;;  %v1725_v53 = vmul.f32 1.442695, %v1710_v57 }
 0x554   :  { %2216 = vrot.lane.b32.xlu0 %v5216_v44, %s5057_s13  ;;  %v1769_v46 = vpack.c.bf16 %v1761_v27, %v1761_v27  ;;  %4976 = vpow2.f32 %v1725_v53 }
 0x556   :  { %4661 = vmatmul.mubr.msk.bf16.vlgmr.msra.gmra.mrb[60].mxu0 %vm413_vm2, %v1769_v46 }
 0x557   :  { %4671 = vmatpush3.bf16.msra.mxu0 %v1978_v22  ;;  %4672 = vmatprep.mubr.msk.bf16.mxu0 %vm5055_vm1, %v5054_v14 }
 0x558   :  { %2318 = vrot.lane.b32.xlu0 %v5199_v32, %s5057_s13  ;;  %4682 = vmatprep.subr.bf16.mxu0 %v5054_v14 }
 0x55c   :  { %2316 = vrot.lane.b32.xlu0 %v5212_v41, %s5057_s13 }
 0x55e   :  { %v5668_v19 = vpop.eup %4976 }
 0x55f   :  { %v1748_v38 = vsel %vm413_vm2, %v5668_v19, 0.0 }
 0x560   :  { %2418 = vrot.lane.b32.xlu0 %v5223_v50, %s5057_s13 }
 0x564   :  { %2416 = vrot.lane.b32.xlu0 %v5257_v62, %s5057_s13 }
 0x568   :  { %2518 = vrot.lane.b32.xlu0 %v5239_v55, %s5057_s13 }
 0x56b   :  { %1749 = vadd.xlane.f32.xlu1 %v1748_v38 }
 0x56c   :  { %2516 = vrot.lane.b32.xlu0 %v5285_v8, %s5057_s13 }
 0x570   :  { %2712 = vrot.lane.b32.xlu0 %v5336_v39, %s5057_s13 }
 0x57c   :  { %2266 = vrot.lane.b32.xlu1 %v5255_v61, %s5057_s13 }
 0x580   :  { %2368 = vrot.lane.b32.xlu1 %v5247_v58, %s5057_s13 }
 0x584   :  { %2366 = vrot.lane.b32.xlu1 %v5283_v7, %s5057_s13 }
 0x586   :  { %v1732_v33 = vpop.xlane.xlu1 %1731 }
 0x587   :  { %4978 = vrcp.f32 %v1732_v33 }
 0x588   :  { %2468 = vrot.lane.b32.xlu1 %v5268_v2, %s5057_s13 }
 0x58c   :  { %2466 = vrot.lane.b32.xlu1 %v5305_v13, %s5057_s13 }
 0x58e   :  { %v1738_v0 = vpop.xlane.xlu1 %1737 }
 0x58f   :  { %4980 = vrcp.f32 %v1738_v0 }
 0x590   :  { %2568 = vrot.lane.b32.xlu1 %v5295_v10, %s5057_s13 }
 0x591   :  { %v4979_v29 = vpop.eup %4978 }
 0x592   :  { %v1741_v25 = vpop.xlane.xlu0 %1740  ;;  %v1760_v35 = vmul.f32 %v4979_v29, %v5618_v3 }
 0x593   :  { %4982 = vrcp.f32 %v1741_v25 }
 0x594   :  { %2566 = vrot.lane.b32.xlu1 %v5315_v18, %s5057_s13  ;;  %v1768_v56 = vpack.c.bf16 %v1760_v35, %v1760_v35 }
 0x596   :  { %4655 = vmatmul.mubr.msk.bf16.vlgmr.msra.gmra.mrb[64].mxu1 %vm413_vm2, %v1768_v56  ;;  %v2071_v47 = vpop.permute.xlu0 %2070 }
 0x597   :  { %4665 = vmatpush3.bf16.msra.mxu1 %v1929_v52  ;;  %4666 = vmatprep.mubr.msk.bf16.mxu1 %vm5055_vm1, %v5054_v14  ;;  %v2076_v16 = vsel %vm881_vm3, %v2071_v47, 0 }
 0x598   :  { %2760 = vrot.lane.b32.xlu1 %v5338_v40, %s5057_s13  ;;  %4676 = vmatprep.subr.bf16.mxu1 %v5054_v14 }
 0x599   :  { %v4981_v3 = vpop.eup %4980 }
 0x59a   :  { %v1762_v9 = vmul.f32 %v4981_v3, %v5622_v26 }
 0x59c   :  { %2808 = vrot.lane.b32.xlu1 %v5420_v42, %s5057_s13  ;;  %v1770_v11 = vpack.c.bf16 %v1762_v9, %v1762_v9 }
 0x59d   :  { %v4983_v36 = vpop.eup %4982 }
 0x59e   :  { %4667 = vmatmul.mubr.msk.bf16.vlgmr.msra.gmra.mrb[68].mxu1 %vm413_vm2, %v1770_v11  ;;  %v1763_v63 = vmul.f32 %v4983_v36, %v5626_v1  ;;  %v2120_v1 = vpop.permute.xlu1 %2119 }
 0x59f   :  { %4677 = vmatpush3.bf16.msra.mxu1 %v2027_v6  ;;  %4678 = vmatprep.mubr.msk.bf16.mxu1 %vm5055_vm1, %v5054_v14  ;;  %v2125_v22 = vsel %vm881_vm3, %v2120_v1, 0 }
 0x5a0   :  { %2856 = vrot.lane.b32.xlu1 %v5436_v21, %s5057_s13  ;;  %v1771_v26 = vpack.c.bf16 %v1763_v63, %v1763_v63  ;;  %4688 = vmatprep.subr.bf16.mxu1 %v5054_v14 }
 0x5a2   :  { %4673 = vmatmul.mubr.msk.bf16.vlgmr.msra.gmra.mrb[64].mxu0 %vm413_vm2, %v1771_v26 }
 0x5a3   :  { %4683 = vmatpush3.bf16.msra.mxu0 %v2076_v16  ;;  %4684 = vmatprep.mubr.msk.bf16.mxu0 %vm5055_vm1, %v5054_v14 }
 0x5a4   :  { %4694 = vmatprep.subr.bf16.mxu0 %v5054_v14 }
 0x5c3   :  { %v1744_v15 = vpop.xlane.xlu1 %1743 }
 0x5c4   :  { %4984 = vrcp.f32 %v1744_v15 }
 0x5c7   :  { %v1747_v20 = vpop.xlane.xlu0 %1746  ;;  %v2269_v9 = vpop.permute.xlu1 %2268 }
 0x5c8   :  { %4986 = vrcp.f32 %v1747_v20  ;;  %v2274_v20 = vsel %vm413_vm2, %v2269_v9, 0 }
 0x5cb   :  { %v2219_v49 = vpop.permute.xlu0 %2218 }
 0x5cc   :  { %v2224_v0 = vsel %vm413_vm2, %v2219_v49, 0 }
 0x5ce   :  { %v4985_v23 = vpop.eup %4984 }
 0x5cf   :  { %v2217_v24 = vpop.permute.xlu0 %2216  ;;  %v1764_v27 = vmul.f32 %v4985_v23, %v5635_v37 }
 0x5d1   :  { %v1772_v46 = vpack.c.bf16 %v1764_v27, %v1764_v27 }
 0x5d2   :  { %v4987_v57 = vpop.eup %4986 }
 0x5d3   :  { %v2319_v53 = vpop.permute.xlu0 %2318  ;;  %4679 = vmatmul.mubr.msk.bf16.vlgmr.msra.gmra.mrb[72].mxu1 %vm413_vm2, %v1772_v46  ;;  %v1765_v38 = vmul.f32 %v4987_v57, %v5639_v54 }
 0x5d4   :  { %4689 = vmatpush3.bf16.msra.mxu1 %v2125_v22  ;;  %4690 = vmatprep.mubr.msk.bf16.mxu1 %vm5055_vm1, %v5054_v14  ;;  %v2324_v54 = vsel %vm413_vm2, %v2319_v53, 0 }
 0x5d5   :  { %v1773_v33 = vpack.c.bf16 %v1765_v38, %v1765_v38  ;;  %4700 = vmatprep.subr.bf16.mxu1 %v5054_v14 }
 0x5d7   :  { %4685 = vmatmul.mubr.msk.bf16.vlgmr.msra.gmra.mrb[68].mxu0 %vm413_vm2, %v1773_v33  ;;  %v2317_v37 = vpop.permute.xlu0 %2316 }
 0x5d8   :  { %4695 = vmatpush3.bf16.xpose.msra.mxu0 %v2224_v0  ;;  %4696 = vmatprep.mubr.msk.bf16.mxu0 %vm5055_vm1, %v5054_v14 }
 0x5d9   :  { %4706 = vmatprep.subr.bf16.mxu0 %v5054_v14 }
 0x5db   :  { %v2419_v29 = vpop.permute.xlu0 %2418 }
 0x5dc   :  { %v2424_v35 = vsel %vm413_vm2, %v2419_v29, 0 }
 0x5df   :  { %4697 = vmatmul.mubr.msk.bf16.vlgmr.msra.gmra.mrb[72].mxu0 %vm413_vm2, %v2217_v24  ;;  %v2417_v25 = vpop.permute.xlu0 %2416 }
 0x5e0   :  { %4707 = vmatpush3.bf16.xpose.msra.mxu0 %v2324_v54  ;;  %4708 = vmatprep.mubr.msk.bf16.mxu0 %vm5055_vm1, %v5054_v14 }
 0x5e1   :  { %4718 = vmatprep.subr.bf16.mxu0 %v5054_v14 }
 0x5e3   :  { %v2519_v56 = vpop.permute.xlu0 %2518 }
 0x5e4   :  { %v2524_v3 = vsel %vm413_vm2, %v2519_v56, 0 }
 0x5e7   :  { %4709 = vmatmul.mubr.msk.bf16.vlgmr.msra.gmra.mrb[76].mxu0 %vm413_vm2, %v2317_v37  ;;  %v2517_v52 = vpop.permute.xlu0 %2516 }
 0x5e8   :  { %4719 = vmatpush3.bf16.xpose.msra.mxu0 %v2424_v35  ;;  %4720 = vmatprep.mubr.msk.bf16.mxu0 %vm5055_vm1, %v5054_v14 }
 0x5e9   :  { %4730 = vmatprep.subr.bf16.mxu0 %v5054_v14 }
 0x5eb   :  { %v2713_v11 = vpop.permute.xlu0 %2712 }
 0x5ec   :  { %v2718_v36 = vsel %vm881_vm3, %v2713_v11, 0 }
 0x5ef   :  { %4721 = vmatmul.mubr.msk.bf16.vlgmr.msra.gmra.mrb[80].mxu0 %vm413_vm2, %v2417_v25 }
 0x5f0   :  { %4731 = vmatpush3.bf16.xpose.msra.mxu0 %v2524_v3  ;;  %4732 = vmatprep.mubr.msk.bf16.mxu0 %vm5055_vm1, %v5054_v14 }
 0x5f1   :  { %4742 = vmatprep.subr.bf16.mxu0 %v5054_v14 }
 0x5f7   :  { %4733 = vmatmul.mubr.msk.bf16.vlgmr.msra.gmra.mrb[84].mxu0 %vm413_vm2, %v2517_v52 }
 0x5f8   :  { %4743 = vmatpush3.bf16.msra.mxu0 %v2718_v36  ;;  %v1750_v6 = vpop.xlane.xlu1 %1749  ;;  %4744 = vmatprep.mubr.msk.bf16.mxu0 %vm5055_vm1, %v5054_v14 }
 0x5f9   :  { %4988 = vrcp.f32 %v1750_v6  ;;  %4754 = vmatprep.subr.bf16.mxu0 %v5054_v14 }
 0x5fc   :  { %v2267_v63 = vpop.permute.xlu1 %2266 }
 0x600   :  { %v2369_v47 = vpop.permute.xlu1 %2368 }
 0x601   :  { %v2374_v23 = vsel %vm413_vm2, %v2369_v47, 0 }
 0x603   :  { %v4989_v26 = vpop.eup %4988 }
 0x604   :  { %v1766_v16 = vmul.f32 %v4989_v26, %v5668_v19  ;;  %v2367_v15 = vpop.permute.xlu1 %2366 }
 0x606   :  { %v1774_v1 = vpack.c.bf16 %v1766_v16, %v1766_v16 }
 0x608   :  { %4691 = vmatmul.mubr.msk.bf16.vlgmr.msra.gmra.mrb[76].mxu1 %vm413_vm2, %v1774_v1  ;;  %v2469_v49 = vpop.permute.xlu1 %2468 }
 0x609   :  { %4701 = vmatpush3.bf16.xpose.msra.mxu1 %v2274_v20  ;;  %4702 = vmatprep.mubr.msk.bf16.mxu1 %vm5055_vm1, %v5054_v14  ;;  %v2474_v24 = vsel %vm413_vm2, %v2469_v49, 0 }
 0x60a   :  { %4712 = vmatprep.subr.bf16.mxu1 %v5054_v14 }
 0x60c   :  { %v2467_v19 = vpop.permute.xlu1 %2466 }
 0x610   :  { %4703 = vmatmul.mubr.msk.bf16.vlgmr.msra.gmra.mrb[80].mxu1 %vm413_vm2, %v2267_v63  ;;  %v2569_v27 = vpop.permute.xlu1 %2568 }
 0x611   :  { %4713 = vmatpush3.bf16.xpose.msra.mxu1 %v2374_v23  ;;  %4714 = vmatprep.mubr.msk.bf16.mxu1 %vm5055_vm1, %v5054_v14  ;;  %v2574_v57 = vsel %vm413_vm2, %v2569_v27, 0 }
 0x612   :  { %4724 = vmatprep.subr.bf16.mxu1 %v5054_v14 }
 0x614   :  { %v2567_v46 = vpop.permute.xlu1 %2566 }
 0x618   :  { %4715 = vmatmul.mubr.msk.bf16.vlgmr.msra.gmra.mrb[84].mxu1 %vm413_vm2, %v2367_v15  ;;  %v2761_v0 = vpop.permute.xlu1 %2760 }
 0x619   :  { %4725 = vmatpush3.bf16.xpose.msra.mxu1 %v2474_v24  ;;  %4726 = vmatprep.mubr.msk.bf16.mxu1 %vm5055_vm1, %v5054_v14  ;;  %v2766_v37 = vsel %vm881_vm3, %v2761_v0, 0 }
 0x61a   :  { %4736 = vmatprep.subr.bf16.mxu1 %v5054_v14 }
 0x620   :  { %4727 = vmatmul.mubr.msk.bf16.vlgmr.msra.gmra.mrb[88].mxu1 %vm413_vm2, %v2467_v19 }
 0x621   :  { %4737 = vmatpush3.bf16.xpose.msra.mxu1 %v2574_v57  ;;  %v5767_v22 = vpop.f32.mrb[56].mxu0  ;;  %4738 = vmatprep.mubr.msk.bf16.mxu1 %vm5055_vm1, %v5054_v14 }
 0x622   :  { %v4650_v53 = vpop.f32.mrb[57].mxu0  ;;  %4748 = vmatprep.subr.bf16.mxu1 %v5054_v14 }
 0x623   :  { %v1821_v38 = vpop.f32.mrb[58].mxu0 }
 0x624   :  { %v4651_v33 = vpop.f32.mrb[59].mxu0 }
 0x628   :  { %4739 = vmatmul.mubr.msk.bf16.vlgmr.msra.gmra.mrb[92].mxu1 %vm413_vm2, %v2567_v46 }
 0x629   :  { %4749 = vmatpush3.bf16.msra.mxu1 %v2766_v37  ;;  %v5774_v29 = vpop.f32.mrb[60].mxu0  ;;  %4750 = vmatprep.mubr.msk.bf16.mxu1 %vm5055_vm1, %v5054_v14 }
 0x62a   :  { %v4662_v54 = vpop.f32.mrb[61].mxu0  ;;  %4760 = vmatprep.subr.bf16.mxu1 %v5054_v14 }
 0x62b   :  { %v1919_v25 = vpop.f32.mrb[62].mxu0 }
 0x62c   :  { %v4663_v35 = vpop.f32.mrb[63].mxu0 }
 0x669   :  { %v5779_v56 = vpop.f32.mrb[64].mxu1 }
 0x66a   :  { %v4656_v52 = vpop.f32.mrb[65].mxu1 }
 0x66b   :  { %v1870_v3 = vpop.f32.mrb[66].mxu1 }
 0x66c   :  { %v4657_v9 = vpop.f32.mrb[67].mxu1 }
 0x671   :  { %v5781_v11 = vpop.f32.mrb[68].mxu1 }
 0x672   :  { %v4668_v36 = vpop.f32.mrb[69].mxu1 }
 0x673   :  { %v1968_v6 = vpop.f32.mrb[70].mxu1 }
 0x674   :  { %v4669_v63 = vpop.f32.mrb[71].mxu1 }
 0x675   :  { %v5783_v47 = vpop.f32.mrb[64].mxu0 }
 0x676   :  { %v4674_v26 = vpop.f32.mrb[65].mxu0 }
 0x677   :  { %v2017_v16 = vpop.f32.mrb[66].mxu0 }
 0x678   :  { %v4675_v1 = vpop.f32.mrb[67].mxu0 }
 0x6a6   :  { %v5785_v15 = vpop.f32.mrb[72].mxu1 }
 0x6a7   :  { %v4680_v20 = vpop.f32.mrb[73].mxu1 }
 0x6a8   :  { %v2066_v49 = vpop.f32.mrb[74].mxu1 }
 0x6a9   :  { %v4681_v23 = vpop.f32.mrb[75].mxu1 }
 0x6aa   :  { %v5787_v19 = vpop.f32.mrb[68].mxu0 }
 0x6ab   :  { %v4686_v24 = vpop.f32.mrb[69].mxu0 }
 0x6ac   :  { %v2115_v27 = vpop.f32.mrb[70].mxu0 }
 0x6ad   :  { %v4687_v46 = vpop.f32.mrb[71].mxu0 }
 0x6b2   :  { %v2260_v57 = vpop.f32.mrb[72].mxu0 }
 0x6b3   :  { %v4698_v53 = vpop.f32.mrb[73].mxu0  ;;  %v2616_v38 = vsel %vm413_vm2, %v2260_v57, -inf }
 0x6b4   :  { %2617 = vmax.xlane.f32.xlu0 %v2616_v38  ;;  %v2263_v33 = vpop.f32.mrb[74].mxu0 }
 0x6b5   :  { %v4699_v0 = vpop.f32.mrb[75].mxu0 }
 0x6ba   :  { %v2360_v37 = vpop.f32.mrb[76].mxu0 }
 0x6bb   :  { %v4710_v54 = vpop.f32.mrb[77].mxu0  ;;  %v2622_v25 = vsel %vm413_vm2, %v2360_v37, -inf }
 0x6bc   :  { %2623 = vmax.xlane.f32.xlu0 %v2622_v25  ;;  %v2363_v35 = vpop.f32.mrb[78].mxu0 }
 0x6bd   :  { %v4711_v52 = vpop.f32.mrb[79].mxu0 }
 0x6c2   :  { %v5791_v3 = vpop.f32.mrb[80].mxu0 }
 0x6c3   :  { %v4722_v9 = vpop.f32.mrb[81].mxu0 }
 0x6c4   :  { %v2463_v36 = vpop.f32.mrb[82].mxu0  ;;  %v2628_v9 = vsel %vm413_vm2, %v5791_v3, -inf }
 0x6c5   :  { %v4723_v6 = vpop.f32.mrb[83].mxu0 }
 0x6ca   :  { %v5793_v63 = vpop.f32.mrb[84].mxu0 }
 0x6cb   :  { %v4734_v26 = vpop.f32.mrb[85].mxu0 }
 0x6cc   :  { %v2563_v16 = vpop.f32.mrb[86].mxu0  ;;  %v2634_v26 = vsel %vm413_vm2, %v5793_v63, -inf }
 0x6cd   :  { %v4735_v1 = vpop.f32.mrb[87].mxu0 }
 0x6db   :  { %v5795_v20 = vpop.f32.mrb[76].mxu1 }
 0x6dc   :  { %v4692_v49 = vpop.f32.mrb[77].mxu1 }
 0x6dd   :  { %v2164_v23 = vpop.f32.mrb[78].mxu1 }
 0x6de   :  { %v4693_v24 = vpop.f32.mrb[79].mxu1 }
 0x6e3   :  { %v2310_v27 = vpop.f32.mrb[80].mxu1 }
 0x6e4   :  { %v4704_v46 = vpop.f32.mrb[81].mxu1  ;;  %v2619_v53 = vsel %vm413_vm2, %v2310_v27, -inf }
 0x6e5   :  { %2620 = vmax.xlane.f32.xlu1 %v2619_v53  ;;  %v2313_v38 = vpop.f32.mrb[82].mxu1 }
 0x6e6   :  { %v4705_v33 = vpop.f32.mrb[83].mxu1 }
 0x6eb   :  { %v2410_v0 = vpop.f32.mrb[84].mxu1 }
 0x6ec   :  { %v4716_v54 = vpop.f32.mrb[85].mxu1  ;;  %v2625_v25 = vsel %vm413_vm2, %v2410_v0, -inf }
 0x6ed   :  { %2626 = vmax.xlane.f32.xlu0 %v2625_v25  ;;  %v2413_v35 = vpop.f32.mrb[86].mxu1 }
 0x6ee   :  { %v4717_v52 = vpop.f32.mrb[87].mxu1 }
 0x6f1   :  { %2629 = vmax.xlane.f32.xlu0 %v2628_v9 }
 0x6f3   :  { %v2510_v36 = vpop.f32.mrb[88].mxu1 }
 0x6f4   :  { %v4728_v6 = vpop.f32.mrb[89].mxu1  ;;  %v2631_v16 = vsel %vm413_vm2, %v2510_v36, -inf }
 0x6f5   :  { %2635 = vmax.xlane.f32.xlu0 %v2634_v26  ;;  %2632 = vmax.xlane.f32.xlu1 %v2631_v16  ;;  %v2513_v1 = vpop.f32.mrb[90].mxu1 }
 0x6f6   :  { %v4729_v49 = vpop.f32.mrb[91].mxu1 }
 0x6f7   :  { %v2809_v49 = vpop.permute.xlu1 %2808 }
 0x6fb   :  { %v5804_v23 = vpop.f32.mrb[92].mxu1 }
 0x6fc   :  { %v4740_v24 = vpop.f32.mrb[93].mxu1  ;;  %v2637_v38 = vsel %vm413_vm2, %v5804_v23, -inf }
 0x6fd   :  { %v2613_v46 = vpop.f32.mrb[94].mxu1 }
 0x6fe   :  { %v4741_v53 = vpop.f32.mrb[95].mxu1 }
 0x706   :  { %2952 = vrot.lane.b32.xlu1 %v5466_v17, %s5057_s13 }
 0x70b   :  { %2904 = vrot.lane.b32.xlu0 %v5440_v4, %s5057_s13 }
 0x72a   :  { %2638 = vmax.xlane.f32.xlu1 %v2637_v38 }
 0x741   :  { %v2618_v33 = vpop.xlane.xlu0 %2617 }
 0x742   :  { %v2640_v54 = vsub.f32 %v2260_v57, %v2618_v33  ;;  %v5820_v57 = vpop.permute.xlu1 %2856 }
 0x744   :  { %v2648_v25 = vmul.f32 1.442695, %v2640_v54 }
 0x746   :  { %4990 = vpow2.f32 %v2648_v25 }
 0x749   :  { %v2624_v35 = vpop.xlane.xlu0 %2623 }
 0x74a   :  { %v2642_v52 = vsub.f32 %v2360_v37, %v2624_v35 }
 0x74c   :  { %v2652_v9 = vmul.f32 1.442695, %v2642_v52 }
 0x74e   :  { %4992 = vpow2.f32 %v2652_v9 }
 0x750   :  { %v5812_v6 = vpop.eup %4990 }
 0x751   :  { %v2664_v26 = vsel %vm413_vm2, %v5812_v6, 0.0 }
 0x752   :  { %2665 = vadd.xlane.f32.xlu0 %v2664_v26 }
 0x758   :  { %v5816_v16 = vpop.eup %4992 }
 0x759   :  { %v2670_v1 = vsel %vm413_vm2, %v5816_v16, 0.0 }
 0x75a   :  { %2671 = vadd.xlane.f32.xlu0 %v2670_v1 }
 0x772   :  { %v2621_v24 = vpop.xlane.xlu1 %2620 }
 0x773   :  { %v2641_v46 = vsub.f32 %v2310_v27, %v2621_v24 }
 0x775   :  { %v2650_v37 = vmul.f32 1.442695, %v2641_v46 }
 0x777   :  { %4994 = vpow2.f32 %v2650_v37 }
 0x77a   :  { %v2627_v53 = vpop.xlane.xlu0 %2626 }
 0x77b   :  { %v2643_v38 = vsub.f32 %v2410_v0, %v2627_v53 }
 0x77d   :  { %v2654_v33 = vmul.f32 1.442695, %v2643_v38 }
 0x77e   :  { %v2630_v54 = vpop.xlane.xlu0 %2629 }
 0x77f   :  { %4996 = vpow2.f32 %v2654_v33  ;;  %v2644_v25 = vsub.f32 %v5791_v3, %v2630_v54 }
 0x781   :  { %v5823_v35 = vpop.eup %4994  ;;  %v2656_v52 = vmul.f32 1.442695, %v2644_v25 }
 0x782   :  { %v2667_v9 = vsel %vm413_vm2, %v5823_v35, 0.0  ;;  %v2633_v3 = vpop.xlane.xlu1 %2632  ;;  %v2636_v46 = vpop.xlane.xlu0 %2635 }
 0x783   :  { %4998 = vpow2.f32 %v2656_v52  ;;  %2668 = vadd.xlane.f32.xlu1 %v2667_v9  ;;  %v2645_v24 = vsub.f32 %v2510_v36, %v2633_v3  ;;  %v2646_v37 = vsub.f32 %v5793_v63, %v2636_v46 }
 0x785   :  { %v2658_v53 = vmul.f32 1.442695, %v2645_v24  ;;  %v2660_v38 = vmul.f32 1.442695, %v2646_v37 }
 0x786   :  { %v2953_v63 = vpop.permute.xlu1 %2952  ;;  %v2905_v36 = vpop.permute.xlu0 %2904 }
 0x787   :  { %5000 = vpow2.f32 %v2658_v53  ;;  %v2958_v37 = vsel %vm881_vm3, %v2953_v63, 0 }
 0x788   :  { %5002 = vpow2.f32 %v2660_v38 }
 0x789   :  { %v5827_v26 = vpop.eup %4996 }
 0x78a   :  { %v2673_v27 = vsel %vm413_vm2, %v5827_v26, 0.0 }
 0x78b   :  { %2674 = vadd.xlane.f32.xlu1 %v2673_v27 }
 0x78d   :  { %v5831_v0 = vpop.eup %4998 }
 0x78e   :  { %v2676_v1 = vsel %vm413_vm2, %v5831_v0, 0.0 }
 0x78f   :  { %2677 = vadd.xlane.f32.xlu0 %v2676_v1 }
 0x791   :  { %v5840_v33 = vpop.eup %5000 }
 0x792   :  { %v2679_v54 = vsel %vm413_vm2, %v5840_v33, 0.0  ;;  %v5844_v25 = vpop.eup %5002 }
 0x793   :  { %v2682_v52 = vsel %vm413_vm2, %v5844_v25, 0.0 }
 0x79c   :  { %3048 = vrot.lane.b32.xlu1 %v5498_v30, %s5057_s13 }
 0x7a5   :  { %3000 = vrot.lane.b32.xlu0 %v5461_v45, %s5057_s13 }
 0x7b7   :  { %v2639_v9 = vpop.xlane.xlu1 %2638 }
 0x7b8   :  { %v2647_v27 = vsub.f32 %v5804_v23, %v2639_v9  ;;  %v2814_v23 = vsel %vm881_vm3, %v2809_v49, 0  ;;  %v2910_v49 = vsel %vm881_vm3, %v2905_v36, 0 }
 0x7ba   :  { %v2662_v3 = vmul.f32 1.442695, %v2647_v27 }
 0x7c0   :  { %2680 = vadd.xlane.f32.xlu1 %v2679_v54 }
 0x7c4   :  { %2683 = vadd.xlane.f32.xlu0 %v2682_v52 }
 0x7d1   :  { %3197 = vrot.lane.b32.xlu1 %v5214_v43, %s5058_s14 }
 0x7da   :  { %3147 = vrot.lane.b32.xlu0 %v5201_v34, %s5058_s14 }
 0x7de   :  { %3145 = vrot.lane.b32.xlu0 %v5216_v44, %s5058_s14 }
 0x7df   :  { %v2666_v1 = vpop.xlane.xlu0 %2665 }
 0x7e0   :  { %5004 = vrcp.f32 %v2666_v1 }
 0x7e1   :  { %5006 = vpow2.f32 %v2662_v3 }
 0x7e2   :  { %3247 = vrot.lane.b32.xlu0 %v5199_v32, %s5058_s14 }
 0x7e6   :  { %3245 = vrot.lane.b32.xlu0 %v5212_v41, %s5058_s14 }
 0x7e7   :  { %v2672_v43 = vpop.xlane.xlu0 %2671 }
 0x7e8   :  { %5008 = vrcp.f32 %v2672_v43 }
 0x7ea   :  { %v5005_v34 = vpop.eup %5004  ;;  %3347 = vrot.lane.b32.xlu0 %v5223_v50, %s5058_s14 }
 0x7eb   :  { %v2696_v44 = vmul.f32 %v5005_v34, %v5812_v6  ;;  %v5868_v32 = vpop.eup %5006 }
 0x7ed   :  { %v2704_v24 = vpack.c.bf16 %v2696_v44, %v2696_v44 }
 0x7ee   :  { %3345 = vrot.lane.b32.xlu0 %v5257_v62, %s5058_s14  ;;  %v2685_v62 = vsel %vm413_vm2, %v5868_v32, 0.0 }
 0x7ef   :  { %4745 = vmatmul.mubr.msk.bf16.vlgmr.msra.gmra.mrb[88].mxu0 %vm413_vm2, %v2704_v24 }
 0x7f0   :  { %4755 = vmatpush3.bf16.msra.mxu0 %v2814_v23  ;;  %4756 = vmatprep.mubr.msk.bf16.mxu0 %vm5055_vm1, %v5054_v14 }
 0x7f1   :  { %4766 = vmatprep.subr.bf16.mxu0 %v5054_v14 }
 0x7f2   :  { %v5009_v41 = vpop.eup %5008  ;;  %3447 = vrot.lane.b32.xlu0 %v5239_v55, %s5058_s14 }
 0x7f3   :  { %v2698_v50 = vmul.f32 %v5009_v41, %v5816_v16 }
 0x7f5   :  { %2686 = vadd.xlane.f32.xlu1 %v2685_v62  ;;  %v2706_v6 = vpack.c.bf16 %v2698_v50, %v2698_v50 }
 0x7f6   :  { %3445 = vrot.lane.b32.xlu0 %v5285_v8, %s5058_s14 }
 0x7f7   :  { %4757 = vmatmul.mubr.msk.bf16.vlgmr.msra.gmra.mrb[92].mxu0 %vm413_vm2, %v2706_v6 }
 0x7f8   :  { %4767 = vmatpush3.bf16.msra.mxu0 %v2910_v49  ;;  %4768 = vmatprep.mubr.msk.bf16.mxu0 %vm5055_vm1, %v5054_v14 }
 0x7f9   :  { %4778 = vmatprep.subr.bf16.mxu0 %v5054_v14 }
 0x806   :  { %3195 = vrot.lane.b32.xlu1 %v5255_v61, %s5058_s14 }
 0x80a   :  { %3297 = vrot.lane.b32.xlu1 %v5247_v58, %s5058_s14 }
 0x80e   :  { %3295 = vrot.lane.b32.xlu1 %v5283_v7, %s5058_s14 }
 0x810   :  { %v2669_v55 = vpop.xlane.xlu1 %2668 }
 0x811   :  { %5010 = vrcp.f32 %v2669_v55 }
 0x812   :  { %3397 = vrot.lane.b32.xlu1 %v5268_v2, %s5058_s14  ;;  %v2862_v2 = vsel %vm881_vm3, %v5820_v57, 0 }
 0x816   :  { %3395 = vrot.lane.b32.xlu1 %v5305_v13, %s5058_s14 }
 0x818   :  { %v2675_v8 = vpop.xlane.xlu1 %2674 }
 0x819   :  { %5012 = vrcp.f32 %v2675_v8 }
 0x81a   :  { %3497 = vrot.lane.b32.xlu1 %v5295_v10, %s5058_s14 }
 0x81b   :  { %v5011_v61 = vpop.eup %5010 }
 0x81c   :  { %v2697_v16 = vmul.f32 %v5011_v61, %v5823_v35  ;;  %v2678_v58 = vpop.xlane.xlu0 %2677 }
 0x81d   :  { %5014 = vrcp.f32 %v2678_v58 }
 0x81e   :  { %3495 = vrot.lane.b32.xlu1 %v5315_v18, %s5058_s14  ;;  %v2705_v7 = vpack.c.bf16 %v2697_v16, %v2697_v16 }
 0x820   :  { %4751 = vmatmul.mubr.msk.bf16.vlgmr.msra.gmra.mrb[96].mxu1 %vm413_vm2, %v2705_v7  ;;  %v3001_v57 = vpop.permute.xlu0 %3000 }
 0x821   :  { %4761 = vmatpush3.bf16.msra.mxu1 %v2862_v2  ;;  %4762 = vmatprep.mubr.msk.bf16.mxu1 %vm5055_vm1, %v5054_v14  ;;  %v3006_v38 = vsel %vm881_vm3, %v3001_v57, 0 }
 0x822   :  { %4772 = vmatprep.subr.bf16.mxu1 %v5054_v14 }
 0x823   :  { %v5013_v10 = vpop.eup %5012 }
 0x824   :  { %v2699_v13 = vmul.f32 %v5013_v10, %v5827_v26  ;;  %v3049_v26 = vpop.permute.xlu1 %3048 }
 0x825   :  { %v3054_v3 = vsel %vm881_vm3, %v3049_v26, 0 }
 0x826   :  { %v2707_v35 = vpack.c.bf16 %v2699_v13, %v2699_v13 }
 0x827   :  { %v5015_v46 = vpop.eup %5014 }
 0x828   :  { %v2700_v18 = vmul.f32 %v5015_v46, %v5831_v0  ;;  %4763 = vmatmul.mubr.msk.bf16.vlgmr.msra.gmra.mrb[100].mxu1 %vm413_vm2, %v2707_v35 }
 0x829   :  { %4773 = vmatpush3.bf16.msra.mxu1 %v2958_v37  ;;  %4774 = vmatprep.mubr.msk.bf16.mxu1 %vm5055_vm1, %v5054_v14 }
 0x82a   :  { %v2708_v53 = vpack.c.bf16 %v2700_v18, %v2700_v18  ;;  %4784 = vmatprep.subr.bf16.mxu1 %v5054_v14 }
 0x82c   :  { %4769 = vmatmul.mubr.msk.bf16.vlgmr.msra.gmra.mrb[96].mxu0 %vm413_vm2, %v2708_v53 }
 0x82d   :  { %4779 = vmatpush3.bf16.msra.mxu0 %v3006_v38  ;;  %4780 = vmatprep.mubr.msk.bf16.mxu0 %vm5055_vm1, %v5054_v14 }
 0x82e   :  { %4790 = vmatprep.subr.bf16.mxu0 %v5054_v14 }
 0x84d   :  { %v2681_v0 = vpop.xlane.xlu1 %2680 }
 0x84e   :  { %5016 = vrcp.f32 %v2681_v0 }
 0x851   :  { %v2684_v54 = vpop.xlane.xlu0 %2683  ;;  %v3198_v49 = vpop.permute.xlu1 %3197 }
 0x852   :  { %5018 = vrcp.f32 %v2684_v54  ;;  %v3203_v10 = vsel %vm413_vm2, %v3198_v49, 0 }
 0x855   :  { %v3148_v52 = vpop.permute.xlu0 %3147 }
 0x856   :  { %v3153_v24 = vsel %vm413_vm2, %v3148_v52, 0 }
 0x858   :  { %v5017_v63 = vpop.eup %5016 }
 0x859   :  { %v2701_v36 = vmul.f32 %v5017_v63, %v5840_v33  ;;  %v3146_v9 = vpop.permute.xlu0 %3145 }
 0x85b   :  { %v2709_v27 = vpack.c.bf16 %v2701_v36, %v2701_v36 }
 0x85c   :  { %v5019_v1 = vpop.eup %5018 }
 0x85d   :  { %v2702_v43 = vmul.f32 %v5019_v1, %v5844_v25  ;;  %4775 = vmatmul.mubr.msk.bf16.vlgmr.msra.gmra.mrb[104].mxu1 %vm413_vm2, %v2709_v27  ;;  %v3248_v34 = vpop.permute.xlu0 %3247 }
 0x85e   :  { %4785 = vmatpush3.bf16.msra.mxu1 %v3054_v3  ;;  %4786 = vmatprep.mubr.msk.bf16.mxu1 %vm5055_vm1, %v5054_v14  ;;  %v3253_v25 = vsel %vm413_vm2, %v3248_v34, 0 }
 0x85f   :  { %v2710_v44 = vpack.c.bf16 %v2702_v43, %v2702_v43  ;;  %4796 = vmatprep.subr.bf16.mxu1 %v5054_v14 }
 0x861   :  { %4781 = vmatmul.mubr.msk.bf16.vlgmr.msra.gmra.mrb[100].mxu0 %vm413_vm2, %v2710_v44  ;;  %v3246_v33 = vpop.permute.xlu0 %3245 }
 0x862   :  { %4791 = vmatpush3.bf16.xpose.msra.mxu0 %v3153_v24  ;;  %4792 = vmatprep.mubr.msk.bf16.mxu0 %vm5055_vm1, %v5054_v14 }
 0x863   :  { %4802 = vmatprep.subr.bf16.mxu0 %v5054_v14 }
 0x865   :  { %v3348_v23 = vpop.permute.xlu0 %3347 }
 0x866   :  { %v3353_v50 = vsel %vm413_vm2, %v3348_v23, 0 }
 0x869   :  { %4793 = vmatmul.mubr.msk.bf16.vlgmr.msra.gmra.mrb[104].mxu0 %vm413_vm2, %v3146_v9  ;;  %v3346_v41 = vpop.permute.xlu0 %3345 }
 0x86a   :  { %4803 = vmatpush3.bf16.xpose.msra.mxu0 %v3253_v25  ;;  %4804 = vmatprep.mubr.msk.bf16.mxu0 %vm5055_vm1, %v5054_v14 }
 0x86b   :  { %4814 = vmatprep.subr.bf16.mxu0 %v5054_v14 }
 0x86d   :  { %v3448_v62 = vpop.permute.xlu0 %3447 }
 0x86e   :  { %v3453_v6 = vsel %vm413_vm2, %v3448_v62, 0 }
 0x871   :  { %4805 = vmatmul.mubr.msk.bf16.vlgmr.msra.gmra.mrb[108].mxu0 %vm413_vm2, %v3246_v33  ;;  %v3446_v55 = vpop.permute.xlu0 %3445 }
 0x872   :  { %4815 = vmatpush3.bf16.xpose.msra.mxu0 %v3353_v50  ;;  %4816 = vmatprep.mubr.msk.bf16.mxu0 %vm5055_vm1, %v5054_v14 }
 0x873   :  { %4826 = vmatprep.subr.bf16.mxu0 %v5054_v14 }
 0x879   :  { %4817 = vmatmul.mubr.msk.bf16.vlgmr.msra.gmra.mrb[112].mxu0 %vm413_vm2, %v3346_v41 }
 0x87a   :  { %4827 = vmatpush3.bf16.xpose.msra.mxu0 %v3453_v6  ;;  %4828 = vmatprep.mubr.msk.bf16.mxu0 %vm5055_vm1, %v5054_v14 }
 0x87b   :  { %4838 = vmatprep.subr.bf16.mxu0 %v5054_v14 }
 0x881   :  { %4829 = vmatmul.mubr.msk.bf16.vlgmr.msra.gmra.mrb[116].mxu0 %vm413_vm2, %v3446_v55 }
 0x882   :  { %v2687_v8 = vpop.xlane.xlu1 %2686  ;;  %4840 = vmatprep.mubr.msk.bf16.mxu0 %vm5055_vm1, %v5054_v14 }
 0x883   :  { %5020 = vrcp.f32 %v2687_v8 }
 0x886   :  { %v3196_v61 = vpop.permute.xlu1 %3195 }
 0x88a   :  { %v3298_v7 = vpop.permute.xlu1 %3297 }
 0x88b   :  { %v3303_v35 = vsel %vm413_vm2, %v3298_v7, 0 }
 0x88d   :  { %v5021_v16 = vpop.eup %5020 }
 0x88e   :  { %v2703_v58 = vmul.f32 %v5021_v16, %v5868_v32  ;;  %v3296_v13 = vpop.permute.xlu1 %3295 }
 0x890   :  { %v2711_v2 = vpack.c.bf16 %v2703_v58, %v2703_v58 }
 0x892   :  { %4787 = vmatmul.mubr.msk.bf16.vlgmr.msra.gmra.mrb[108].mxu1 %vm413_vm2, %v2711_v2  ;;  %v3398_v46 = vpop.permute.xlu1 %3397 }
 0x893   :  { %4797 = vmatpush3.bf16.xpose.msra.mxu1 %v3203_v10  ;;  %4798 = vmatprep.mubr.msk.bf16.mxu1 %vm5055_vm1, %v5054_v14  ;;  %v3403_v37 = vsel %vm413_vm2, %v3398_v46, 0 }
 0x894   :  { %4808 = vmatprep.subr.bf16.mxu1 %v5054_v14 }
 0x896   :  { %v3396_v32 = vpop.permute.xlu1 %3395 }
 0x89a   :  { %4799 = vmatmul.mubr.msk.bf16.vlgmr.msra.gmra.mrb[112].mxu1 %vm413_vm2, %v3196_v61  ;;  %v3498_v18 = vpop.permute.xlu1 %3497 }
 0x89b   :  { %4809 = vmatpush3.bf16.xpose.msra.mxu1 %v3303_v35  ;;  %4810 = vmatprep.mubr.msk.bf16.mxu1 %vm5055_vm1, %v5054_v14  ;;  %v3503_v57 = vsel %vm413_vm2, %v3498_v18, 0 }
 0x89c   :  { %4820 = vmatprep.subr.bf16.mxu1 %v5054_v14 }
 0x89e   :  { %v3496_v53 = vpop.permute.xlu1 %3495 }
 0x8a2   :  { %4811 = vmatmul.mubr.msk.bf16.vlgmr.msra.gmra.mrb[116].mxu1 %vm413_vm2, %v3296_v13 }
 0x8a3   :  { %4821 = vmatpush3.bf16.xpose.msra.mxu1 %v3403_v37  ;;  %4822 = vmatprep.mubr.msk.bf16.mxu1 %vm5055_vm1, %v5054_v14 }
 0x8a4   :  { %4832 = vmatprep.subr.bf16.mxu1 %v5054_v14 }
 0x8aa   :  { %4823 = vmatmul.mubr.msk.bf16.vlgmr.msra.gmra.mrb[120].mxu1 %vm413_vm2, %v3396_v32 }
 0x8ab   :  { %4833 = vmatpush3.bf16.xpose.msra.mxu1 %v3503_v57  ;;  %4834 = vmatprep.mubr.msk.bf16.mxu1 %vm5055_vm1, %v5054_v14 }
 0x8ac   :  { %4844 = vmatprep.subr.bf16.mxu1 %v5054_v14 }
 0x8b2   :  { %4835 = vmatmul.mubr.msk.bf16.vlgmr.msra.gmra.mrb[124].mxu1 %vm413_vm2, %v3496_v53 }
 0x8b3   :  { %4846 = vmatprep.mubr.msk.bf16.mxu1 %vm5055_vm1, %v5054_v14 }
 0x8c2   :  { %v5970_v38 = vpop.f32.mrb[88].mxu0 }
 0x8c3   :  { %v4746_v26 = vpop.f32.mrb[89].mxu0 }
 0x8c4   :  { %v2757_v0 = vpop.f32.mrb[90].mxu0 }
 0x8c5   :  { %v4747_v54 = vpop.f32.mrb[91].mxu0 }
 0x8ca   :  { %v5972_v52 = vpop.f32.mrb[92].mxu0 }
 0x8cb   :  { %v4758_v63 = vpop.f32.mrb[93].mxu0 }
 0x8cc   :  { %v2853_v36 = vpop.f32.mrb[94].mxu0 }
 0x8cd   :  { %v4759_v9 = vpop.f32.mrb[95].mxu0 }
 0x8f3   :  { %v5974_v27 = vpop.f32.mrb[96].mxu1 }
 0x8f4   :  { %v4752_v1 = vpop.f32.mrb[97].mxu1 }
 0x8f5   :  { %v2805_v3 = vpop.f32.mrb[98].mxu1 }
 0x8f6   :  { %v4753_v43 = vpop.f32.mrb[99].mxu1 }
 0x8fb   :  { %v5976_v34 = vpop.f32.mrb[100].mxu1 }
 0x8fc   :  { %v4764_v44 = vpop.f32.mrb[101].mxu1 }
 0x8fd   :  { %v2901_v24 = vpop.f32.mrb[102].mxu1 }
 0x8fe   :  { %v4765_v33 = vpop.f32.mrb[103].mxu1 }
 0x8ff   :  { %v5978_v25 = vpop.f32.mrb[96].mxu0 }
 0x900   :  { %v4770_v23 = vpop.f32.mrb[97].mxu0 }
 0x901   :  { %v2949_v41 = vpop.f32.mrb[98].mxu0 }
 0x902   :  { %v4771_v50 = vpop.f32.mrb[99].mxu0 }
 0x930   :  { %v5980_v62 = vpop.f32.mrb[104].mxu1 }
 0x931   :  { %v4776_v6 = vpop.f32.mrb[105].mxu1 }
 0x932   :  { %v2997_v49 = vpop.f32.mrb[106].mxu1 }
 0x933   :  { %v4777_v55 = vpop.f32.mrb[107].mxu1 }
 0x934   :  { %v5982_v8 = vpop.f32.mrb[100].mxu0 }
 0x935   :  { %v4782_v61 = vpop.f32.mrb[101].mxu0 }
 0x936   :  { %v3045_v16 = vpop.f32.mrb[102].mxu0 }
 0x937   :  { %v4783_v58 = vpop.f32.mrb[103].mxu0 }
 0x93c   :  { %v3189_v7 = vpop.f32.mrb[104].mxu0 }
 0x93d   :  { %v4794_v2 = vpop.f32.mrb[105].mxu0  ;;  %v3545_v10 = vsel %vm413_vm2, %v3189_v7, -inf }
 0x93e   :  { %3546 = vmax.xlane.f32.xlu0 %v3545_v10  ;;  %v3192_v13 = vpop.f32.mrb[106].mxu0 }
 0x93f   :  { %v4795_v35 = vpop.f32.mrb[107].mxu0 }
 0x944   :  { %v3289_v46 = vpop.f32.mrb[108].mxu0 }
 0x945   :  { %v4806_v32 = vpop.f32.mrb[109].mxu0  ;;  %v3551_v37 = vsel %vm413_vm2, %v3289_v46, -inf }
 0x946   :  { %3552 = vmax.xlane.f32.xlu0 %v3551_v37  ;;  %v3292_v18 = vpop.f32.mrb[110].mxu0 }
 0x947   :  { %v4807_v57 = vpop.f32.mrb[111].mxu0 }
 0x94c   :  { %v5986_v53 = vpop.f32.mrb[112].mxu0 }
 0x94d   :  { %v4818_v26 = vpop.f32.mrb[113].mxu0  ;;  %v3557_v2 = vsel %vm413_vm2, %v5986_v53, -inf }
 0x94e   :  { %v3392_v0 = vpop.f32.mrb[114].mxu0 }
 0x94f   :  { %v4819_v54 = vpop.f32.mrb[115].mxu0 }
 0x954   :  { %v5988_v63 = vpop.f32.mrb[116].mxu0 }
 0x955   :  { %v4830_v36 = vpop.f32.mrb[117].mxu0  ;;  %v3563_v35 = vsel %vm413_vm2, %v5988_v63, -inf }
 0x956   :  { %v3492_v9 = vpop.f32.mrb[118].mxu0 }
 0x957   :  { %v4831_v1 = vpop.f32.mrb[119].mxu0 }
 0x965   :  { %v5990_v3 = vpop.f32.mrb[108].mxu1 }
 0x966   :  { %v4788_v43 = vpop.f32.mrb[109].mxu1 }
 0x967   :  { %v3093_v44 = vpop.f32.mrb[110].mxu1 }
 0x968   :  { %v4789_v24 = vpop.f32.mrb[111].mxu1 }
 0x96d   :  { %v3239_v33 = vpop.f32.mrb[112].mxu1 }
 0x96e   :  { %v4800_v23 = vpop.f32.mrb[113].mxu1  ;;  %v3548_v41 = vsel %vm413_vm2, %v3239_v33, -inf }
 0x96f   :  { %3549 = vmax.xlane.f32.xlu1 %v3548_v41  ;;  %v3242_v50 = vpop.f32.mrb[114].mxu1 }
 0x970   :  { %v4801_v6 = vpop.f32.mrb[115].mxu1 }
 0x975   :  { %v5993_v49 = vpop.f32.mrb[116].mxu1 }
 0x976   :  { %v4812_v55 = vpop.f32.mrb[117].mxu1  ;;  %v3554_v61 = vsel %vm413_vm2, %v5993_v49, -inf }
 0x977   :  { %3555 = vmax.xlane.f32.xlu0 %v3554_v61  ;;  %v3342_v16 = vpop.f32.mrb[118].mxu1 }
 0x978   :  { %v4813_v58 = vpop.f32.mrb[119].mxu1 }
 0x97b   :  { %3558 = vmax.xlane.f32.xlu0 %v3557_v2 }
 0x97d   :  { %v5999_v10 = vpop.f32.mrb[120].mxu1 }
 0x97e   :  { %v4824_v13 = vpop.f32.mrb[121].mxu1  ;;  %v3560_v32 = vsel %vm413_vm2, %v5999_v10, -inf }
 0x97f   :  { %3564 = vmax.xlane.f32.xlu0 %v3563_v35  ;;  %3561 = vmax.xlane.f32.xlu1 %v3560_v32  ;;  %v3442_v37 = vpop.f32.mrb[122].mxu1 }
 0x980   :  { %v4825_v18 = vpop.f32.mrb[123].mxu1 }
 0x985   :  { %v6005_v57 = vpop.f32.mrb[124].mxu1 }
 0x986   :  { %v4836_v26 = vpop.f32.mrb[125].mxu1  ;;  %v3566_v36 = vsel %vm413_vm2, %v6005_v57, -inf }
 0x987   :  { %v3542_v0 = vpop.f32.mrb[126].mxu1 }
 0x988   :  { %v4837_v54 = vpop.f32.mrb[127].mxu1 }
 0x990   :  { %3689 = vrot.lane.b32.xlu1 %v5338_v40, %s5058_s14 }
 0x994   :  { %3737 = vrot.lane.b32.xlu1 %v5420_v42, %s5058_s14 }
 0x995   :  { %3641 = vrot.lane.b32.xlu0 %v5336_v39, %s5058_s14 }
 0x9b8   :  { %3567 = vmax.xlane.f32.xlu1 %v3566_v36 }
 0x9c9   :  { %3785 = vrot.lane.b32.xlu1 %v5436_v21, %s5058_s14 }
 0x9cb   :  { %v3547_v9 = vpop.xlane.xlu0 %3546 }
 0x9cc   :  { %v3569_v1 = vsub.f32 %v3189_v7, %v3547_v9 }
 0x9ce   :  { %v3577_v43 = vmul.f32 1.442695, %v3569_v1 }
 0x9d0   :  { %5022 = vpow2.f32 %v3577_v43 }
 0x9d3   :  { %v3553_v44 = vpop.xlane.xlu0 %3552 }
 0x9d4   :  { %v3571_v24 = vsub.f32 %v3289_v46, %v3553_v44 }
 0x9d6   :  { %v3581_v40 = vmul.f32 1.442695, %v3571_v24 }
 0x9d8   :  { %5024 = vpow2.f32 %v3581_v40 }
 0x9da   :  { %v6017_v23 = vpop.eup %5022 }
 0x9db   :  { %v3593_v39 = vsel %vm413_vm2, %v6017_v23, 0.0 }
 0x9dc   :  { %3594 = vadd.xlane.f32.xlu0 %v3593_v39 }
 0x9e2   :  { %v6021_v42 = vpop.eup %5024 }
 0x9e3   :  { %v3599_v41 = vsel %vm413_vm2, %v6021_v42, 0.0 }
 0x9e4   :  { %3600 = vadd.xlane.f32.xlu0 %v3599_v41 }
 0x9fa   :  { %3833 = vrot.lane.b32.xlu0 %v5440_v4, %s5058_s14 }
 0x9fc   :  { %v3550_v21 = vpop.xlane.xlu1 %3549 }
 0x9fd   :  { %v3570_v7 = vsub.f32 %v3239_v33, %v3550_v21 }
 0x9ff   :  { %v3579_v46 = vmul.f32 1.442695, %v3570_v7 }
 0xa01   :  { %5026 = vpow2.f32 %v3579_v46 }
 0xa04   :  { %v3556_v50 = vpop.xlane.xlu0 %3555 }
 0xa05   :  { %v3572_v54 = vsub.f32 %v5993_v49, %v3556_v50 }
 0xa07   :  { %v3583_v36 = vmul.f32 1.442695, %v3572_v54 }
 0xa08   :  { %v3559_v6 = vpop.xlane.xlu0 %3558 }
 0xa09   :  { %v3573_v55 = vsub.f32 %v5986_v53, %v3559_v6 }
 0xa0b   :  { %v6028_v61 = vpop.eup %5026  ;;  %v3585_v16 = vmul.f32 1.442695, %v3573_v55 }
 0xa0c   :  { %v3565_v58 = vpop.xlane.xlu0 %3564  ;;  %v3562_v2 = vpop.xlane.xlu1 %3561  ;;  %v3596_v13 = vsel %vm413_vm2, %v6028_v61, 0.0 }
 0xa0d   :  { %5028 = vpow2.f32 %v3585_v16  ;;  %v3575_v35 = vsub.f32 %v5988_v63, %v3565_v58  ;;  %3597 = vadd.xlane.f32.xlu1 %v3596_v13  ;;  %v3574_v9 = vsub.f32 %v5999_v10, %v3562_v2 }
 0xa0f   :  { %v3589_v4 = vmul.f32 1.442695, %v3575_v35  ;;  %v3587_v1 = vmul.f32 1.442695, %v3574_v9 }
 0xa10   :  { %v3642_v33 = vpop.permute.xlu0 %3641  ;;  %v3690_v32 = vpop.permute.xlu1 %3689 }
 0xa11   :  { %5030 = vpow2.f32 %v3589_v4  ;;  %v3647_v37 = vsel %vm881_vm3, %v3642_v33, 0  ;;  %v3695_v53 = vsel %vm881_vm3, %v3690_v32, 0 }
 0xa12   :  { %4839 = vmatpush3.bf16.msra.mxu0 %v3647_v37  ;;  %4845 = vmatpush3.bf16.msra.mxu1 %v3695_v53  ;;  %5032 = vpow2.f32 %v3583_v36 }
 0xa13   :  { %4850 = vmatprep.subr.bf16.mxu0 %v5054_v14  ;;  %4856 = vmatprep.subr.bf16.mxu1 %v5054_v14  ;;  %5034 = vpow2.f32 %v3587_v1 }
 0xa17   :  { %v6037_v18 = vpop.eup %5028 }
 0xa18   :  { %v3605_v63 = vsel %vm413_vm2, %v6037_v18, 0.0 }
 0xa19   :  { %3606 = vadd.xlane.f32.xlu0 %v3605_v63 }
 0xa1b   :  { %v6041_v26 = vpop.eup %5030 }
 0xa1c   :  { %v3611_v0 = vsel %vm413_vm2, %v6041_v26, 0.0  ;;  %v6055_v43 = vpop.eup %5032 }
 0xa1d   :  { %3612 = vadd.xlane.f32.xlu0 %v3611_v0  ;;  %v6061_v49 = vpop.eup %5034 }
 0xa1e   :  { %3881 = vrot.lane.b32.xlu1 %v5466_v17, %s5058_s14  ;;  %v3738_v17 = vpop.permute.xlu1 %3737 }
 0xa1f   :  { %v3743_v44 = vsel %vm881_vm3, %v3738_v17, 0 }
 0xa33   :  { %3929 = vrot.lane.b32.xlu0 %v5461_v45, %s5058_s14  ;;  %v3602_v45 = vsel %vm413_vm2, %v6055_v43, 0.0 }
 0xa37   :  { %2175 = vrot.lane.b32.xlu0 %v5767_v22, %s5059_s15 }
 0xa3b   :  { %2179 = vrot.lane.b32.xlu0 %v5774_v29, %s5059_s15  ;;  %v3608_v29 = vsel %vm413_vm2, %v6061_v49, 0.0 }
 0xa3f   :  { %3104 = vrot.lane.b32.xlu0 %v5970_v38, %s5060_s16 }
 0xa42   :  { %3603 = vadd.xlane.f32.xlu1 %v3602_v45 }
 0xa43   :  { %3108 = vrot.lane.b32.xlu0 %v5972_v52, %s5060_s16 }
 0xa45   :  { %v3568_v22 = vpop.xlane.xlu1 %3567 }
 0xa46   :  { %v3576_v10 = vsub.f32 %v6005_v57, %v3568_v22  ;;  %3609 = vadd.xlane.f32.xlu1 %v3608_v29 }
 0xa47   :  { %2183 = vrot.lane.b32.xlu0 %v5783_v47, %s5059_s15 }
 0xa48   :  { %v3591_v38 = vmul.f32 1.442695, %v3576_v10 }
 0xa4a   :  { %5036 = vpow2.f32 %v3591_v38 }
 0xa4b   :  { %2187 = vrot.lane.b32.xlu0 %v5787_v19, %s5059_s15 }
 0xa4f   :  { %3112 = vrot.lane.b32.xlu0 %v5978_v25, %s5060_s16 }
 0xa53   :  { %3116 = vrot.lane.b32.xlu0 %v5982_v8, %s5060_s16 }
 0xa54   :  { %v6076_v52 = vpop.eup %5036 }
 0xa55   :  { %v3614_v57 = vsel %vm413_vm2, %v6076_v52, 0.0 }
 0xa56   :  { %3615 = vadd.xlane.f32.xlu1 %v3614_v57 }
 0xa67   :  { %3977 = vrot.lane.b32.xlu1 %v5498_v30, %s5058_s14 }
 0xa69   :  { %v3595_v47 = vpop.xlane.xlu0 %3594 }
 0xa6a   :  { %5038 = vrcp.f32 %v3595_v47 }
 0xa6b   :  { %2177 = vrot.lane.b32.xlu1 %v5779_v56, %s5059_s15 }
 0xa6f   :  { %2181 = vrot.lane.b32.xlu1 %v5781_v11, %s5059_s15 }
 0xa71   :  { %v3601_v19 = vpop.xlane.xlu0 %3600 }
 0xa72   :  { %5040 = vrcp.f32 %v3601_v19 }
 0xa73   :  { %3106 = vrot.lane.b32.xlu1 %v5974_v27, %s5060_s16 }
 0xa74   :  { %v5039_v25 = vpop.eup %5038 }
 0xa75   :  { %v3625_v8 = vmul.f32 %v5039_v25, %v6017_v23  ;;  %v3834_v27 = vpop.permute.xlu0 %3833 }
 0xa76   :  { %v3839_v24 = vsel %vm881_vm3, %v3834_v27, 0 }
 0xa77   :  { %3110 = vrot.lane.b32.xlu1 %v5976_v34, %s5060_s16  ;;  %v3633_v30 = vpack.c.bf16 %v3625_v8, %v3625_v8 }
 0xa79   :  { %4841 = vmatmul.mubr.msk.bf16.vlgmr.msra.gmra.mrb[120].mxu0 %vm413_vm2, %v3633_v30 }
 0xa7a   :  { %4851 = vmatpush3.bf16.msra.mxu0 %v3743_v44  ;;  %4852 = vmatprep.mubr.msk.bf16.mxu0 %vm5055_vm1, %v5054_v14 }
 0xa7b   :  { %2185 = vrot.lane.b32.xlu1 %v5785_v15, %s5059_s15  ;;  %4862 = vmatprep.subr.bf16.mxu0 %v5054_v14  ;;  %v3786_v15 = vpop.permute.xlu1 %3785 }
 0xa7c   :  { %v5041_v56 = vpop.eup %5040  ;;  %v3791_v41 = vsel %vm881_vm3, %v3786_v15, 0 }
 0xa7d   :  { %v3627_v11 = vmul.f32 %v5041_v56, %v6021_v42 }
 0xa7f   :  { %2189 = vrot.lane.b32.xlu1 %v5795_v20, %s5059_s15  ;;  %v3635_v34 = vpack.c.bf16 %v3627_v11, %v3627_v11 }
 0xa81   :  { %4853 = vmatmul.mubr.msk.bf16.vlgmr.msra.gmra.mrb[124].mxu0 %vm413_vm2, %v3635_v34 }
 0xa82   :  { %4863 = vmatpush3.bf16.msra.mxu0 %v3839_v24  ;;  %4864 = vmatprep.mubr.msk.bf16.mxu0 %vm5055_vm1, %v5054_v14 }
 0xa83   :  { %3114 = vrot.lane.b32.xlu1 %v5980_v62, %s5060_s16  ;;  %4874 = vmatprep.subr.bf16.mxu0 %v5054_v14 }
 0xa87   :  { %3118 = vrot.lane.b32.xlu1 %v5990_v3, %s5060_s16 }
 0xa9a   :  { %v3598_v40 = vpop.xlane.xlu1 %3597 }
 0xa9b   :  { %5042 = vrcp.f32 %v3598_v40 }
 0xa9e   :  { %v3882_v0 = vpop.permute.xlu1 %3881 }
 0xa9f   :  { %v3887_v38 = vsel %vm881_vm3, %v3882_v0, 0  ;;  %v4925_v0 = vld [vmem:[%s6342_s8 + $0x8] sm:$0xff]  }
 0xaa5   :  { %v5043_v20 = vpop.eup %5042 }
 0xaa6   :  { %v3626_v23 = vmul.f32 %v5043_v20, %v6028_v61  ;;  %v3607_v39 = vpop.xlane.xlu0 %3606 }
 0xaa7   :  { %5044 = vrcp.f32 %v3607_v39 }
 0xaa8   :  { %v3634_v42 = vpack.c.bf16 %v3626_v23, %v3626_v23 }
 0xaaa   :  { %v3613_v21 = vpop.xlane.xlu0 %3612  ;;  %4847 = vmatmul.mubr.msk.bf16.vlgmr.msra.gmra.mrb[128].mxu1 %vm413_vm2, %v3634_v42 }
 0xaab   :  { %5046 = vrcp.f32 %v3613_v21  ;;  %4857 = vmatpush3.bf16.msra.mxu1 %v3791_v41  ;;  %4858 = vmatprep.mubr.msk.bf16.mxu1 %vm5055_vm1, %v5054_v14 }
 0xaac   :  { %4868 = vmatprep.subr.bf16.mxu1 %v5054_v14 }
 0xaae   :  { %v3930_v62 = vpop.permute.xlu0 %3929 }
 0xaaf   :  { %v3935_v61 = vsel %vm881_vm3, %v3930_v62, 0 }
 0xab1   :  { %v5045_v3 = vpop.eup %5044 }
 0xab2   :  { %v3629_v7 = vmul.f32 %v5045_v3, %v6037_v18  ;;  %v2176_v46 = vpop.permute.xlu0 %2175 }
 0xab3   :  { %v2199_v50 = vadd.f32 %v2176_v46, %v5197_v31 }
 0xab4   :  { %v3637_v6 = vpack.c.bf16 %v3629_v7, %v3629_v7 }
 0xab5   :  { %v5047_v55 = vpop.eup %5046  ;;  %2208 = vst.msk [vmem:[%s6341_s10] sm:$0xff] %vm2207_vm4, %v2199_v50 }
 0xab6   :  { %v2180_v16 = vpop.permute.xlu0 %2179  ;;  %4865 = vmatmul.mubr.msk.bf16.vlgmr.msra.gmra.mrb[128].mxu0 %vm413_vm2, %v3637_v6  ;;  %v3631_v2 = vmul.f32 %v5047_v55, %v6041_v26 }
 0xab7   :  { %v2201_v58 = vadd.f32 %v2180_v16, %v5193_v28  ;;  %4875 = vmatpush3.bf16.msra.mxu0 %v3935_v61  ;;  %4876 = vmatprep.mubr.msk.bf16.mxu0 %vm5055_vm1, %v5054_v14 }
 0xab8   :  { %v3639_v4 = vpack.c.bf16 %v3631_v2, %v3631_v2 }
 0xab9   :  { %2210 = vst.msk [vmem:[%s6341_s10 + $0x10] sm:$0xff] %vm2207_vm4, %v2201_v58 }
 0xaba   :  { %v3105_v13 = vpop.permute.xlu0 %3104 }
 0xabb   :  { %v3128_v35 = vadd.f32 %v3105_v13, %v5197_v31 }
 0xabd   :  { %3137 = vst.msk [vmem:[%s6341_s10] sm:$0xff] %vm3136_vm5, %v3128_v35 }
 0xabe   :  { %v3109_v33 = vpop.permute.xlu0 %3108  ;;  %4877 = vmatmul.mubr.msk.bf16.vlgmr.msra.gmra.mrb[132].mxu0 %vm413_vm2, %v3639_v4 }
 0xabf   :  { %v3130_v32 = vadd.f32 %v3109_v33, %v5193_v28 }
 0xac1   :  { %3139 = vst.msk [vmem:[%s6341_s10 + $0x10] sm:$0xff] %vm3136_vm5, %v3130_v32 }
 0xac2   :  { %v2184_v37 = vpop.permute.xlu0 %2183 }
 0xac3   :  { %v2203_v53 = vadd.f32 %v2184_v37, %v5220_v48 }
 0xac5   :  { %2212 = vst.msk [vmem:[%s6341_s10 + $0x20] sm:$0xff] %vm2207_vm4, %v2203_v53 }
 0xac6   :  { %v2188_v18 = vpop.permute.xlu0 %2187 }
 0xac7   :  { %v2205_v63 = vadd.f32 %v2188_v18, %v5250_v59 }
 0xac9   :  { %2214 = vst.msk [vmem:[%s6341_s10 + $0x30] sm:$0xff] %vm2207_vm4, %v2205_v63 }
 0xaca   :  { %v3113_v26 = vpop.permute.xlu0 %3112 }
 0xacb   :  { %v3132_v54 = vadd.f32 %v3113_v26, %v5220_v48  ;;  %v4924_v26 = vld [vmem:[%s6342_s8] sm:$0xff]  }
 0xacc   :  { %4886 = vmatprep.subr.bf16.mxu0 %v4924_v26 }
 0xacd   :  { %3141 = vst.msk [vmem:[%s6341_s10 + $0x20] sm:$0xff] %vm3136_vm5, %v3132_v54  ;;  %4887 = vmatpush3.bf16.msra.mxu0 %v4924_v26 }
 0xace   :  { %v3117_v36 = vpop.permute.xlu0 %3116  ;;  %4888 = vmatprep.subr.bf16.mxu0 %v4925_v0 }
 0xacf   :  { %v3134_v9 = vadd.f32 %v3117_v36, %v5250_v59  ;;  %v3604_v1 = vpop.xlane.xlu1 %3603 }
 0xad0   :  { %5048 = vrcp.f32 %v3604_v1 }
 0xad1   :  { %3143 = vst.msk [vmem:[%s6341_s10 + $0x30] sm:$0xff] %vm3136_vm5, %v3134_v9  ;;  %4889 = vmatpush3.bf16.msra.mxu0 %v4925_v0 }
 0xad3   :  { %v3610_v17 = vpop.xlane.xlu1 %3609 }
 0xad4   :  { %5050 = vrcp.f32 %v3610_v17 }
 0xada   :  { %v5049_v45 = vpop.eup %5048 }
 0xadb   :  { %v3628_v22 = vmul.f32 %v5049_v45, %v6055_v43 }
 0xadd   :  { %v3636_v29 = vpack.c.bf16 %v3628_v22, %v3628_v22 }
 0xade   :  { %v5051_v10 = vpop.eup %5050 }
 0xadf   :  { %4859 = vmatmul.mubr.msk.bf16.vlgmr.msra.gmra.mrb[132].mxu1 %vm413_vm2, %v3636_v29  ;;  %v3630_v57 = vmul.f32 %v5051_v10, %v6061_v49 }
 0xae0   :  { %4869 = vmatpush3.bf16.msra.mxu1 %v3887_v38  ;;  %4870 = vmatprep.mubr.msk.bf16.mxu1 %vm5055_vm1, %v5054_v14 }
 0xae1   :  { %4880 = vmatprep.subr.bf16.mxu1 %v5054_v14  ;;  %v3638_v19 = vpack.c.bf16 %v3630_v57, %v3630_v57 }
 0xae3   :  { %v3616_v47 = vpop.xlane.xlu1 %3615 }
 0xae4   :  { %5052 = vrcp.f32 %v3616_v47 }
 0xae7   :  { %4871 = vmatmul.mubr.msk.bf16.vlgmr.msra.gmra.mrb[136].mxu1 %vm413_vm2, %v3638_v19  ;;  %v3978_v43 = vpop.permute.xlu1 %3977 }
 0xae8   :  { %v3983_v25 = vsel %vm881_vm3, %v3978_v43, 0  ;;  %4882 = vmatprep.mubr.msk.bf16.mxu1 %vm5055_vm1, %v5054_v14 }
 0xae9   :  { %4881 = vmatpush3.bf16.msra.mxu1 %v3983_v25 }
 0xaeb   :  { %v2178_v8 = vpop.permute.xlu1 %2177 }
 0xaec   :  { %v2200_v30 = vadd.f32 %v2178_v8, %v5226_v51 }
 0xaee   :  { %v5053_v44 = vpop.eup %5052  ;;  %2209 = vst.msk [vmem:[%s6341_s10 + $0x8] sm:$0xff] %vm2207_vm4, %v2200_v30 }
 0xaef   :  { %v3632_v49 = vmul.f32 %v5053_v44, %v6076_v52  ;;  %v2182_v56 = vpop.permute.xlu1 %2181 }
 0xaf0   :  { %v2202_v11 = vadd.f32 %v2182_v56, %v5253_v60 }
 0xaf1   :  { %v3640_v27 = vpack.c.bf16 %v3632_v49, %v3632_v49 }
 0xaf2   :  { %2211 = vst.msk [vmem:[%s6341_s10 + $0x18] sm:$0xff] %vm2207_vm4, %v2202_v11 }
 0xaf3   :  { %4883 = vmatmul.mubr.msk.bf16.vlgmr.msra.gmra.mrb[140].mxu1 %vm413_vm2, %v3640_v27  ;;  %v3107_v14 = vpop.permute.xlu1 %3106 }
 0xaf4   :  { %v3129_v34 = vadd.f32 %v3107_v14, %v5226_v51 }
 0xaf6   :  { %3138 = vst.msk [vmem:[%s6341_s10 + $0x8] sm:$0xff] %vm3136_vm5, %v3129_v34 }
 0xaf7   :  { %v3111_v52 = vpop.permute.xlu1 %3110 }
 0xaf8   :  { %v3131_v24 = vadd.f32 %v3111_v52, %v5253_v60 }
 0xafa   :  { %3140 = vst.msk [vmem:[%s6341_s10 + $0x18] sm:$0xff] %vm3136_vm5, %v3131_v24 }
 0xafb   :  { %v2186_v15 = vpop.permute.xlu1 %2185 }
 0xafc   :  { %v2204_v40 = vadd.f32 %v2186_v15, %v5280_v5 }
 0xafe   :  { %2213 = vst.msk [vmem:[%s6341_s10 + $0x28] sm:$0xff] %vm2207_vm4, %v2204_v40 }
 0xaff   :  { %v2190_v20 = vpop.permute.xlu1 %2189 }
 0xb00   :  { %v2206_v23 = vadd.f32 %v2190_v20, %v5303_v12 }
 0xb02   :  { %2215 = vst.msk [vmem:[%s6341_s10 + $0x38] sm:$0xff] %vm2207_vm4, %v2206_v23 }
 0xb03   :  { %v3115_v39 = vpop.permute.xlu1 %3114 }
 0xb04   :  { %v3133_v42 = vadd.f32 %v3115_v39, %v5280_v5 }
 0xb06   :  { %3142 = vst.msk [vmem:[%s6341_s10 + $0x28] sm:$0xff] %vm3136_vm5, %v3133_v42 }
 0xb07   :  { %v3119_v41 = vpop.permute.xlu1 %3118 }
 0xb08   :  { %v3135_v21 = vadd.f32 %v3119_v41, %v5303_v12 }
 0xb0a   :  { %3144 = vst.msk [vmem:[%s6341_s10 + $0x38] sm:$0xff] %vm3136_vm5, %v3135_v21 }
 0xb4c   :  { %v3683_v62 = vpop.f32.mrb[120].mxu0 }
 0xb4d   :  { %4033 = vrot.lane.b32.xlu0 %v3683_v62, %s5061_s19  ;;  %v4842_v3 = vpop.f32.mrb[121].mxu0 }
 0xb4e   :  { %v3686_v7 = vpop.f32.mrb[122].mxu0 }
 0xb4f   :  { %v4843_v46 = vpop.f32.mrb[123].mxu0 }
 0xb54   :  { %v3779_v50 = vpop.f32.mrb[124].mxu0 }
 0xb55   :  { %4037 = vrot.lane.b32.xlu0 %v3779_v50, %s5061_s19  ;;  %v4854_v6 = vpop.f32.mrb[125].mxu0 }
 0xb56   :  { %v3782_v55 = vpop.f32.mrb[126].mxu0 }
 0xb57   :  { %v4855_v61 = vpop.f32.mrb[127].mxu0 }
 0xb7d   :  { %v3731_v16 = vpop.f32.mrb[128].mxu1 }
 0xb7e   :  { %4035 = vrot.lane.b32.xlu1 %v3731_v16, %s5061_s19  ;;  %v4848_v58 = vpop.f32.mrb[129].mxu1 }
 0xb7f   :  { %v3734_v2 = vpop.f32.mrb[130].mxu1 }
 0xb80   :  { %v4849_v13 = vpop.f32.mrb[131].mxu1 }
 0xb89   :  { %v3875_v35 = vpop.f32.mrb[128].mxu0 }
 0xb8a   :  { %4041 = vrot.lane.b32.xlu0 %v3875_v35, %s5061_s19  ;;  %v4866_v4 = vpop.f32.mrb[129].mxu0 }
 0xb8b   :  { %v3878_v33 = vpop.f32.mrb[130].mxu0 }
 0xb8c   :  { %v4867_v32 = vpop.f32.mrb[131].mxu0 }
 0xb91   :  { %v3971_v37 = vpop.f32.mrb[132].mxu0 }
 0xb92   :  { %4045 = vrot.lane.b32.xlu0 %v3971_v37, %s5061_s19  ;;  %v4878_v53 = vpop.f32.mrb[133].mxu0 }
 0xb93   :  { %v3974_v18 = vpop.f32.mrb[134].mxu0 }
 0xb94   :  { %v4879_v63 = vpop.f32.mrb[135].mxu0 }
 0xbb2   :  { %v3827_v54 = vpop.f32.mrb[132].mxu1 }
 0xbb3   :  { %4039 = vrot.lane.b32.xlu1 %v3827_v54, %s5061_s19  ;;  %v4860_v36 = vpop.f32.mrb[133].mxu1 }
 0xbb4   :  { %v3830_v9 = vpop.f32.mrb[134].mxu1 }
 0xbb5   :  { %v4861_v1 = vpop.f32.mrb[135].mxu1 }
 0xbba   :  { %v3923_v17 = vpop.f32.mrb[136].mxu1 }
 0xbbb   :  { %4043 = vrot.lane.b32.xlu1 %v3923_v17, %s5061_s19  ;;  %v4872_v45 = vpop.f32.mrb[137].mxu1 }
 0xbbc   :  { %v3926_v22 = vpop.f32.mrb[138].mxu1 }
 0xbbd   :  { %v4873_v29 = vpop.f32.mrb[139].mxu1 }
 0xbbf   :  { %v4034_v10 = vpop.permute.xlu0 %4033 }
 0xbc0   :  { %v4057_v38 = vadd.f32 %v4034_v10, %v5197_v31 }
 0xbc2   :  { %4066 = vst.msk [vmem:[%s6341_s10] sm:$0xff] %vm4065_vm6, %v4057_v38 }
 0xbc6   :  { %v4019_v57 = vpop.f32.mrb[140].mxu1 }
 0xbc7   :  { %v4038_v47 = vpop.permute.xlu0 %4037  ;;  %4047 = vrot.lane.b32.xlu1 %v4019_v57, %s5061_s19  ;;  %v4884_v19 = vpop.f32.mrb[141].mxu1 }
 0xbc8   :  { %v4059_v43 = vadd.f32 %v4038_v47, %v5193_v28  ;;  %v4022_v25 = vpop.f32.mrb[142].mxu1 }
 0xbc9   :  { %v4885_v8 = vpop.f32.mrb[143].mxu1  ;;  %v4074_v44 = vld [vmem:[%s6341_s10] sm:$0xff] }
 0xbca   :  { %4068 = vst.msk [vmem:[%s6341_s10 + $0x10] sm:$0xff] %vm4065_vm6, %v4059_v43 }
 0xbf0   :  { %v4036_v31 = vpop.permute.xlu1 %4035 }
 0xbf1   :  { %v4058_v30 = vadd.f32 %v4036_v31, %v5226_v51 }
 0xbf3   :  { %4067 = vst.msk [vmem:[%s6341_s10 + $0x8] sm:$0xff] %vm4065_vm6, %v4058_v30 }
 0xbfa   :  { %v4075_v28 = vld [vmem:[%s6341_s10 + $0x8] sm:$0xff] }
 0xbfb   :  { %v4082_v49 = vpack.c.bf16 %v4075_v28, %v4074_v44 }
 0xbfc   :  { %v4042_v56 = vpop.permute.xlu0 %4041 }
 0xbfd   :  { %v4061_v11 = vadd.f32 %v4042_v56, %v5220_v48  ;;  %4890 = vmatprep.mubr.msk.bf16.mxu0 %vm95_vm0, %v4082_v49 }
 0xbff   :  { %4070 = vst.msk [vmem:[%s6341_s10 + $0x20] sm:$0xff] %vm4065_vm6, %v4061_v11 }
 0xc04   :  { %v4046_v51 = vpop.permute.xlu0 %4045 }
 0xc05   :  { %v4063_v27 = vadd.f32 %v4046_v51, %v5250_v59  ;;  %v4076_v59 = vld [vmem:[%s6341_s10 + $0x10] sm:$0xff] }
 0xc07   :  { %4072 = vst.msk [vmem:[%s6341_s10 + $0x30] sm:$0xff] %vm4065_vm6, %v4063_v27 }
 0xc0e   :  { %v4080_v39 = vld [vmem:[%s6341_s10 + $0x30] sm:$0xff] }
 0xc25   :  { %v4040_v14 = vpop.permute.xlu1 %4039 }
 0xc26   :  { %v4060_v34 = vadd.f32 %v4040_v14, %v5253_v60 }
 0xc28   :  { %4069 = vst.msk [vmem:[%s6341_s10 + $0x18] sm:$0xff] %vm4065_vm6, %v4060_v34 }
 0xc2d   :  { %v4044_v48 = vpop.permute.xlu1 %4043 }
 0xc2e   :  { %v4062_v52 = vadd.f32 %v4044_v48, %v5280_v5  ;;  %v4078_v5 = vld [vmem:[%s6341_s10 + $0x20] sm:$0xff] }
 0xc2f   :  { %v4077_v24 = vld [vmem:[%s6341_s10 + $0x18] sm:$0xff] }
 0xc30   :  { %4071 = vst.msk [vmem:[%s6341_s10 + $0x28] sm:$0xff] %vm4065_vm6, %v4062_v52  ;;  %v4083_v60 = vpack.c.bf16 %v4077_v24, %v4076_v59 }
 0xc32   :  { %4891 = vmatmul.mubr.msk.bf16.vlgmr.msra.gmra.mrb[136].mxu0 %vm95_vm0, %v4083_v60 }
 0xc37   :  { %v4079_v15 = vld [vmem:[%s6341_s10 + $0x28] sm:$0xff] }
 0xc38   :  { %v4084_v40 = vpack.c.bf16 %v4079_v15, %v4078_v5 }
 0xc39   :  { %v4048_v20 = vpop.permute.xlu1 %4047 }
 0xc3a   :  { %v4064_v23 = vadd.f32 %v4048_v20, %v5303_v12  ;;  %4894 = vmatprep.mubr.msk.bf16.mxu0 %vm95_vm0, %v4084_v40  ;;  %v4307_v12 = vld [vmem:[%s6343_s9] ss:$0 sm:$0xff] }
 0xc3c   :  { %4073 = vst.msk [vmem:[%s6341_s10 + $0x38] sm:$0xff] %vm4065_vm6, %v4064_v23 }
 0xc43   :  { %v4081_v42 = vld [vmem:[%s6341_s10 + $0x38] sm:$0xff] }
 0xc44   :  { %v4085_v41 = vpack.c.bf16 %v4081_v42, %v4080_v39 }
 0xc46   :  { %4895 = vmatmul.mubr.msk.bf16.gmra.mrb[140].mxu0 %vm95_vm0, %v4085_v41 }
 0xd05   :  { %v4892_v21 = vpop.f32.mrb[136].mxu0 }
 0xd06   :  { %v4164_v62 = vadd.f32 %v4892_v21, %v4307_v12  ;;  %v4155_v3 = vpop.f32.mrb[137].mxu0 }
 0xd07   :  { %v4156_v7 = vadd.f32 %v4307_v12, %v4155_v3  ;;  %v4893_v46 = vpop.f32.mrb[138].mxu0 }
 0xd08   :  { %v4188_v50 = vmax.f32 %v4164_v62, 0.0  ;;  %v4167_v6 = vadd.f32 %v4893_v46, %v4307_v12  ;;  %v4158_v55 = vpop.f32.mrb[139].mxu0 }
 0xd09   :  { %v4186_v61 = vmax.f32 %v4156_v7, 0.0  ;;  %v4159_v16 = vadd.f32 %v4307_v12, %v4158_v55 }
 0xd0a   :  { %v4196_v58 = vadd.f32 %v4188_v50, %v4076_v59  ;;  %v4189_v2 = vmax.f32 %v4167_v6, 0.0 }
 0xd0b   :  { %v4194_v13 = vadd.f32 %v4186_v61, %v4074_v44  ;;  %v4187_v35 = vmax.f32 %v4159_v16, 0.0 }
 0xd0c   :  { %4204 = vst.msk [vmem:[%s6341_s10 + $0x10] sm:$0xff] %vm95_vm0, %v4196_v58  ;;  %v4197_v4 = vadd.f32 %v4189_v2, %v4077_v24 }
 0xd0d   :  { %4202 = vst.msk [vmem:[%s6341_s10] sm:$0xff] %vm95_vm0, %v4194_v13  ;;  %v4195_v33 = vadd.f32 %v4187_v35, %v4075_v28 }
 0xd0e   :  { %4205 = vst.msk [vmem:[%s6341_s10 + $0x18] sm:$0xff] %vm95_vm0, %v4197_v4 }
 0xd0f   :  { %4203 = vst.msk [vmem:[%s6341_s10 + $0x8] sm:$0xff] %vm95_vm0, %v4195_v33 }
 0xd19   :  { %v4896_v32 = vpop.f32.mrb[140].mxu0 }
 0xd1a   :  { %v4180_v37 = vadd.f32 %v4896_v32, %v4307_v12  ;;  %v4171_v53 = vpop.f32.mrb[141].mxu0 }
 0xd1b   :  { %v4172_v18 = vadd.f32 %v4307_v12, %v4171_v53  ;;  %v4897_v63 = vpop.f32.mrb[142].mxu0 }
 0xd1c   :  { %v4192_v26 = vmax.f32 %v4180_v37, 0.0  ;;  %v4183_v0 = vadd.f32 %v4897_v63, %v4307_v12  ;;  %v4174_v54 = vpop.f32.mrb[143].mxu0 }
 0xd1d   :  { %v4190_v36 = vmax.f32 %v4172_v18, 0.0  ;;  %v4175_v9 = vadd.f32 %v4307_v12, %v4174_v54 }
 0xd1e   :  { %v4200_v1 = vadd.f32 %v4192_v26, %v4080_v39  ;;  %v4193_v17 = vmax.f32 %v4183_v0, 0.0 }
 0xd1f   :  { %v4198_v45 = vadd.f32 %v4190_v36, %v4078_v5  ;;  %v4191_v22 = vmax.f32 %v4175_v9, 0.0 }
 0xd20   :  { %4208 = vst.msk [vmem:[%s6341_s10 + $0x30] sm:$0xff] %vm95_vm0, %v4200_v1  ;;  %v4201_v29 = vadd.f32 %v4193_v17, %v4081_v42 }
 0xd21   :  { %4206 = vst.msk [vmem:[%s6341_s10 + $0x20] sm:$0xff] %vm95_vm0, %v4198_v45  ;;  %v4199_v10 = vadd.f32 %v4191_v22, %v4079_v15 }
 0xd22   :  { %4209 = vst.msk [vmem:[%s6341_s10 + $0x38] sm:$0xff] %vm95_vm0, %v4201_v29 }
 0xd23   :  { %4207 = vst.msk [vmem:[%s6341_s10 + $0x28] sm:$0xff] %vm95_vm0, %v4199_v10 }

</bundles_post_ra>
